<compile_context>
chip_gen: v5e
topology: v5e:2x2
jax: 0.10.0
libtpu: 0.0.40
codegen_flags: <defaults>
</compile_context>

<pallas_src>
import functools

import jax
import jax.numpy as jnp
from jax import lax
from jax.experimental import pallas as pl
from jax.experimental.pallas import tpu as pltpu


def _sigmoid(z):
    # Single-transcendental logistic: sigmoid(x) = 0.5 * tanh(0.5 * x) + 0.5
    return 0.5 * jnp.tanh(0.5 * z) + 0.5


def lstm_kernel(x_ref, wih_ref, whh_ref, b_ref, wfc_ref, bfc_ref,
                out_ref, xg_ref, h_ref, c_ref, *, seq_len, unroll):
    Tc, Bp, I = x_ref.shape
    Hp = whh_ref.shape[0]
    chunk = pl.program_id(0)

    # First chunk: zero-initialize the carried hidden / cell state.
    @pl.when(chunk == 0)
    def _():
        h_ref[...] = jnp.zeros_like(h_ref)
        c_ref[...] = jnp.zeros_like(c_ref)

    # Per-chunk input projection for all Tc timesteps at once (off the serial
    # recurrence critical path); bias broadcast hoisted out of the time loop.
    # Stored in bf16 to halve the scratch footprint and vld/vst traffic.
    x_chunk = x_ref[...].reshape(Tc * Bp, I)
    xg = jnp.dot(x_chunk, wih_ref[...], preferred_element_type=jnp.float32)
    xg = xg + b_ref[...]
    xg_ref[...] = xg.reshape(Tc, Bp, 4 * Hp).astype(jnp.bfloat16)

    t0 = chunk * Tc

    def step(t, carry):
        h, c = carry                                           # f32 (Bp, Hp)
        gates = (xg_ref[t].astype(jnp.float32)
                 + jnp.dot(h.astype(jnp.bfloat16), whh_ref[...],
                           preferred_element_type=jnp.float32))
        i = _sigmoid(gates[:, 0:Hp])
        f = _sigmoid(gates[:, Hp:2 * Hp])
        g = jnp.tanh(gates[:, 2 * Hp:3 * Hp])
        o = _sigmoid(gates[:, 3 * Hp:4 * Hp])
        c_new = f * c + i * g
        h_new = o * jnp.tanh(c_new)
        # Timesteps past the real sequence length (T padded up to a Tc
        # multiple) must leave the carried state untouched.
        valid = (t0 + t) < seq_len
        return jnp.where(valid, h_new, h), jnp.where(valid, c_new, c)

    h, c = lax.fori_loop(0, Tc, step, (h_ref[...], c_ref[...]), unroll=unroll)
    h_ref[...] = h
    c_ref[...] = c

    # Final FC on the last hidden state, written once on the last chunk.
    @pl.when(chunk == pl.num_programs(0) - 1)
    def _():
        out_ref[...] = (jnp.dot(h.astype(jnp.bfloat16), wfc_ref[...],
                                preferred_element_type=jnp.float32)
                        + bfc_ref[...])


def lstm_model_forward(x, w_ih, w_hh, b_ih, b_hh, w_fc, b_fc, *, t_chunk=32):
    """x: (B, T, I) — same semantics as LSTMModel.forward (returns (B, O))."""
    B, T, I = x.shape
    H = w_hh.shape[1]
    O = w_fc.shape[0]

    Bp = ((B + 7) // 8) * 8            # pad batch to the sublane granule
    Hp = ((H + 127) // 128) * 128      # pad hidden so each gate slab is a lane tile
    Tc = min(T, t_chunk)               # timesteps per grid step
    Tp = ((T + Tc - 1) // Tc) * Tc
    n_chunks = Tp // Tc

    # Time-major input, batch padded, T padded to a multiple of Tc.
    x_p = jnp.pad(x.astype(jnp.float32), ((0, Bp - B), (0, Tp - T), (0, 0)))
    x_tbi = jnp.transpose(x_p, (1, 0, 2)).astype(jnp.bfloat16)        # (Tp, Bp, I)

    # Re-pack LSTM weights: PyTorch gate order i,f,g,o; zero-pad each gate slab.
    def pad_gates(w, in_dim, in_pad):
        w4 = w.reshape(4, H, in_dim)
        w4 = jnp.pad(w4, ((0, 0), (0, Hp - H), (0, in_pad)))
        return w4.reshape(4 * Hp, in_dim + in_pad)

    wih_t = pad_gates(w_ih.astype(jnp.float32), I, 0).T.astype(jnp.bfloat16)       # (I, 4Hp)
    whh_t = pad_gates(w_hh.astype(jnp.float32), H, Hp - H).T.astype(jnp.bfloat16)  # (Hp, 4Hp)

    b = (b_ih + b_hh).astype(jnp.float32).reshape(4, H)
    b = jnp.pad(b, ((0, 0), (0, Hp - H))).reshape(1, 4 * Hp)                       # (1, 4Hp) f32

    wfc_t = jnp.pad(w_fc.astype(jnp.float32),
                    ((0, 0), (0, Hp - H))).T.astype(jnp.bfloat16)                  # (Hp, O)
    bfc = b_fc.astype(jnp.float32).reshape(1, O)

    # Scoped-VMEM sizing: chunked x (double-buffered) + resident weights +
    # bf16 xg scratch + h/c scratch + output, with headroom.
    vmem_bytes = (
        2 * (Tc * Bp * I * 2)                               # x chunk, 2 buffers, bf16
        + 2 * (I * 4 * Hp + Hp * 4 * Hp + Hp * O) * 2       # weights bf16 (buffer slack)
        + 2 * (4 * Hp + O) * 4                              # biases f32
        + 2 * (Bp * O * 4)                                  # output f32
        + Tc * Bp * 4 * Hp * 2                              # xg scratch bf16
        + 2 * (Bp * Hp * 4)                                 # h, c scratch f32
    )
    vmem_limit = int(max(16 << 20, min(vmem_bytes * 2 + (2 << 20), 96 << 20)))

    kernel = functools.partial(lstm_kernel, seq_len=T, unroll=min(8, Tc))

    out = pl.pallas_call(
        kernel,
        out_shape=jax.ShapeDtypeStruct((Bp, O), jnp.float32),
        grid_spec=pltpu.PrefetchScalarGridSpec(
            num_scalar_prefetch=0,
            grid=(n_chunks,),
            in_specs=[
                pl.BlockSpec((Tc, Bp, I), lambda t: (t, 0, 0)),     # x, chunked over T
                pl.BlockSpec((I, 4 * Hp), lambda t: (0, 0)),        # W_ih^T, resident
                pl.BlockSpec((Hp, 4 * Hp), lambda t: (0, 0)),       # W_hh^T, resident
                pl.BlockSpec((1, 4 * Hp), lambda t: (0, 0)),        # fused bias
                pl.BlockSpec((Hp, O), lambda t: (0, 0)),            # W_fc^T
                pl.BlockSpec((1, O), lambda t: (0, 0)),             # b_fc
            ],
            out_specs=pl.BlockSpec((Bp, O), lambda t: (0, 0)),      # resident accumulator
            scratch_shapes=[
                pltpu.VMEM((Tc, Bp, 4 * Hp), jnp.bfloat16),         # per-chunk x-projection
                pltpu.VMEM((Bp, Hp), jnp.float32),                  # h carry
                pltpu.VMEM((Bp, Hp), jnp.float32),                  # c carry
            ],
        ),
        compiler_params=pltpu.CompilerParams(
            dimension_semantics=("arbitrary",),
            vmem_limit_bytes=vmem_limit,
        ),
    )(x_tbi, wih_t, whh_t, b, wfc_t, bfc)

    return out[:B]


def lstm_model_reference(x, w_ih, w_hh, b_ih, b_hh, w_fc, b_fc):
    """Pure-JAX f32 reference of the PyTorch forward (for correctness check)."""
    B, T, I = x.shape
    H = w_hh.shape[1]

    def step(carry, x_t):
        h, c = carry
        gates = x_t @ w_ih.T + b_ih + h @ w_hh.T + b_hh
        i = jax.nn.sigmoid(gates[:, 0:H])
        f = jax.nn.sigmoid(gates[:, H:2 * H])
        g = jnp.tanh(gates[:, 2 * H:3 * H])
        o = jax.nn.sigmoid(gates[:, 3 * H:4 * H])
        c = f * c + i * g
        h = o * jnp.tanh(c)
        return (h, c), h

    h0 = jnp.zeros((B, H), jnp.float32)
    c0 = jnp.zeros((B, H), jnp.float32)
    (h_last, _), _ = jax.lax.scan(step, (h0, c0), jnp.transpose(x, (1, 0, 2)))
    return h_last @ w_fc.T + b_fc


if __name__ == "__main__":
    # Small shapes consistent with the module's forward: x (B, T, input_size)
    B, T, I, H, O = 2, 8, 16, 32, 4

    key = jax.random.PRNGKey(0)
    ks = jax.random.split(key, 7)
    k_scale = 1.0 / jnp.sqrt(H)

    x = jax.random.normal(ks[0], (B, T, I), jnp.float32)
    w_ih = jax.random.uniform(ks[1], (4 * H, I), jnp.float32, -k_scale, k_scale)
    w_hh = jax.random.uniform(ks[2], (4 * H, H), jnp.float32, -k_scale, k_scale)
    b_ih = jax.random.uniform(ks[3], (4 * H,), jnp.float32, -k_scale, k_scale)
    b_hh = jax.random.uniform(ks[4], (4 * H,), jnp.float32, -k_scale, k_scale)
    w_fc = jax.random.uniform(ks[5], (O, H), jnp.float32, -k_scale, k_scale)
    b_fc = jax.random.uniform(ks[6], (O,), jnp.float32, -k_scale, k_scale)

    out = lstm_model_forward(x, w_ih, w_hh, b_ih, b_hh, w_fc, b_fc)
    out = jax.block_until_ready(out)

    ref = lstm_model_reference(x, w_ih, w_hh, b_ih, b_hh, w_fc, b_fc)
    assert out.shape == (B, O)
    # bf16 matmul operands + bf16 xg staging -> loose tolerance vs f32 reference.
    assert jnp.allclose(out, ref, atol=5e-2, rtol=5e-2), (out, ref)

    print("KERNEL_OK")
</pallas_src>

<mosaic_0001>
module attributes {stable_mosaic.version = 11 : i64} {
  func.func @lstm_kernel(%arg0: i32, %arg1: memref<8x8x16xbf16, #tpu.memory_space<vmem>>, %arg2: memref<16x512xbf16, #tpu.memory_space<vmem>>, %arg3: memref<128x512xbf16, #tpu.memory_space<vmem>>, %arg4: memref<1x512xf32, #tpu.memory_space<vmem>>, %arg5: memref<128x4xbf16, #tpu.memory_space<vmem>>, %arg6: memref<1x4xf32, #tpu.memory_space<vmem>>, %arg7: memref<8x4xf32, #tpu.memory_space<vmem>>, %arg8: memref<8x8x512xbf16, #tpu.memory_space<vmem>>, %arg9: memref<8x128xf32, #tpu.memory_space<vmem>>, %arg10: memref<8x128xf32, #tpu.memory_space<vmem>>) attributes {dimension_semantics = [#tpu.dimension_semantics<arbitrary>], iteration_bounds = array<i64: 1>, scalar_prefetch = 0 : i64, scratch_operands = 3 : i64, tpu.core_type = #tpu.core_type<tc>, window_params = [{transform_indices = @transform_0, window_bounds = array<i64: 8, 8, 16>}, {pipeline_mode = #tpu.pipeline_mode<synchronous>, transform_indices = @transform_1, window_bounds = array<i64: 16, 512>}, {pipeline_mode = #tpu.pipeline_mode<synchronous>, transform_indices = @transform_2, window_bounds = array<i64: 128, 512>}, {pipeline_mode = #tpu.pipeline_mode<synchronous>, transform_indices = @transform_3, window_bounds = array<i64: 1, 512>}, {pipeline_mode = #tpu.pipeline_mode<synchronous>, transform_indices = @transform_4, window_bounds = array<i64: 128, 4>}, {pipeline_mode = #tpu.pipeline_mode<synchronous>, transform_indices = @transform_5, window_bounds = array<i64: 1, 4>}, {pipeline_mode = #tpu.pipeline_mode<synchronous>, transform_indices = @transform_6, window_bounds = array<i64: 8, 4>}]} {
    %c0_i32 = arith.constant 0 : i32
    %0 = arith.cmpi eq, %arg0, %c0_i32 : i32
    %1 = arith.extui %0 : i1 to i32
    %c0_i32_0 = arith.constant 0 : i32
    %2 = arith.cmpi ne, %1, %c0_i32_0 : i32
    scf.if %2 {
      %cst_142 = arith.constant 0.000000e+00 : f32
      %365 = vector.broadcast %cst_142 : f32 to vector<8x128xf32>
      %c0_143 = arith.constant 0 : index
      %c0_144 = arith.constant 0 : index
      %366 = vector.load %arg9[%c0_143, %c0_144] : memref<8x128xf32, #tpu.memory_space<vmem>>, vector<8x128xf32>
      tpu.vector_store %arg9[%c0_143, %c0_144], %365 {strides = array<i32>} : memref<8x128xf32, #tpu.memory_space<vmem>>, vector<8x128xf32>,
      %cst_145 = arith.constant 0.000000e+00 : f32
      %367 = vector.broadcast %cst_145 : f32 to vector<8x128xf32>
      %c0_146 = arith.constant 0 : index
      %c0_147 = arith.constant 0 : index
      %368 = vector.load %arg10[%c0_146, %c0_147] : memref<8x128xf32, #tpu.memory_space<vmem>>, vector<8x128xf32>
      tpu.vector_store %arg10[%c0_146, %c0_147], %367 {strides = array<i32>} : memref<8x128xf32, #tpu.memory_space<vmem>>, vector<8x128xf32>,
    } else {
    }
    %c0 = arith.constant 0 : index
    %c0_1 = arith.constant 0 : index
    %c0_2 = arith.constant 0 : index
    %3 = vector.load %arg1[%c0, %c0_1, %c0_2] : memref<8x8x16xbf16, #tpu.memory_space<vmem>>, vector<8x8x16xbf16>
    %4 = vector.shape_cast %3 : vector<8x8x16xbf16> to vector<64x16xbf16>
    %c0_3 = arith.constant 0 : index
    %c0_4 = arith.constant 0 : index
    %5 = vector.load %arg2[%c0_3, %c0_4] : memref<16x512xbf16, #tpu.memory_space<vmem>>, vector<16x512xbf16>
    %cst = arith.constant dense<0.000000e+00> : vector<64x512xf32>
    %6 = tpu.matmul %4, %5, %cst {dimension_numbers = #tpu.dot_dimension_numbers<[1], [0], [0], [1], [0, 0, 1, 1], [], []>} : vector<64x16xbf16>, vector<16x512xbf16>, vector<64x512xf32> -> vector<64x512xf32>
    %c0_5 = arith.constant 0 : index
    %c0_6 = arith.constant 0 : index
    %7 = vector.load %arg4[%c0_5, %c0_6] : memref<1x512xf32, #tpu.memory_space<vmem>>, vector<1x512xf32>
    %8 = vector.broadcast %7 : vector<1x512xf32> to vector<64x512xf32>
    %9 = arith.addf %6, %8 : vector<64x512xf32>
    %10 = vector.shape_cast %9 : vector<64x512xf32> to vector<8x8x512xf32>
    %11 = arith.truncf %10 : vector<8x8x512xf32> to vector<8x8x512xbf16>
    %c0_7 = arith.constant 0 : index
    %c0_8 = arith.constant 0 : index
    %c0_9 = arith.constant 0 : index
    %12 = vector.load %arg8[%c0_7, %c0_8, %c0_9] : memref<8x8x512xbf16, #tpu.memory_space<vmem>>, vector<8x8x512xbf16>
    tpu.vector_store %arg8[%c0_7, %c0_8, %c0_9], %11 {strides = array<i32>} : memref<8x8x512xbf16, #tpu.memory_space<vmem>>, vector<8x8x512xbf16>,
    %c8_i32 = arith.constant 8 : i32
    %13 = arith.muli %arg0, %c8_i32 : i32
    %c0_10 = arith.constant 0 : index
    %c0_11 = arith.constant 0 : index
    %14 = vector.load %arg9[%c0_10, %c0_11] : memref<8x128xf32, #tpu.memory_space<vmem>>, vector<8x128xf32>
    %c0_12 = arith.constant 0 : index
    %c0_13 = arith.constant 0 : index
    %15 = vector.load %arg10[%c0_12, %c0_13] : memref<8x128xf32, #tpu.memory_space<vmem>>, vector<8x128xf32>
    %c0_i32_14 = arith.constant 0 : i32
    %16 = arith.index_cast %c0_i32_14 : i32 to index
    %c0_15 = arith.constant 0 : index
    %c0_16 = arith.constant 0 : index
    %17 = vector.load %arg8[%16, %c0_15, %c0_16] : memref<8x8x512xbf16, #tpu.memory_space<vmem>>, vector<1x8x512xbf16>
    %18 = vector.shape_cast %17 : vector<1x8x512xbf16> to vector<8x512xbf16>
    %19 = arith.extf %18 : vector<8x512xbf16> to vector<8x512xf32>
    %20 = arith.truncf %14 : vector<8x128xf32> to vector<8x128xbf16>
    %c0_17 = arith.constant 0 : index
    %c0_18 = arith.constant 0 : index
    %21 = vector.load %arg3[%c0_17, %c0_18] : memref<128x512xbf16, #tpu.memory_space<vmem>>, vector<128x512xbf16>
    %cst_19 = arith.constant dense<0.000000e+00> : vector<8x512xf32>
    %22 = tpu.matmul %20, %21, %cst_19 {dimension_numbers = #tpu.dot_dimension_numbers<[1], [0], [0], [1], [0, 0, 1, 1], [], []>} : vector<8x128xbf16>, vector<128x512xbf16>, vector<8x512xf32> -> vector<8x512xf32>
    %23 = arith.addf %19, %22 : vector<8x512xf32>
    %24 = vector.extract_strided_slice %23 {offsets = [0, 0], sizes = [8, 128], strides = [1, 1]} : vector<8x512xf32> to vector<8x128xf32>
    %cst_20 = arith.constant 5.000000e-01 : f32
    %25 = vector.broadcast %cst_20 : f32 to vector<8x128xf32>
    %26 = arith.mulf %25, %24 : vector<8x128xf32>
    %27 = math.tanh %26 : vector<8x128xf32>
    %cst_21 = arith.constant 5.000000e-01 : f32
    %28 = vector.broadcast %cst_21 : f32 to vector<8x128xf32>
    %29 = arith.mulf %28, %27 : vector<8x128xf32>
    %cst_22 = arith.constant 5.000000e-01 : f32
    %30 = vector.broadcast %cst_22 : f32 to vector<8x128xf32>
    %31 = arith.addf %29, %30 : vector<8x128xf32>
    %32 = vector.extract_strided_slice %23 {offsets = [0, 128], sizes = [8, 128], strides = [1, 1]} : vector<8x512xf32> to vector<8x128xf32>
    %cst_23 = arith.constant 5.000000e-01 : f32
    %33 = vector.broadcast %cst_23 : f32 to vector<8x128xf32>
    %34 = arith.mulf %33, %32 : vector<8x128xf32>
    %35 = math.tanh %34 : vector<8x128xf32>
    %cst_24 = arith.constant 5.000000e-01 : f32
    %36 = vector.broadcast %cst_24 : f32 to vector<8x128xf32>
    %37 = arith.mulf %36, %35 : vector<8x128xf32>
    %cst_25 = arith.constant 5.000000e-01 : f32
    %38 = vector.broadcast %cst_25 : f32 to vector<8x128xf32>
    %39 = arith.addf %37, %38 : vector<8x128xf32>
    %40 = vector.extract_strided_slice %23 {offsets = [0, 256], sizes = [8, 128], strides = [1, 1]} : vector<8x512xf32> to vector<8x128xf32>
    %41 = math.tanh %40 : vector<8x128xf32>
    %42 = vector.extract_strided_slice %23 {offsets = [0, 384], sizes = [8, 128], strides = [1, 1]} : vector<8x512xf32> to vector<8x128xf32>
    %cst_26 = arith.constant 5.000000e-01 : f32
    %43 = vector.broadcast %cst_26 : f32 to vector<8x128xf32>
    %44 = arith.mulf %43, %42 : vector<8x128xf32>
    %45 = math.tanh %44 : vector<8x128xf32>
    %cst_27 = arith.constant 5.000000e-01 : f32
    %46 = vector.broadcast %cst_27 : f32 to vector<8x128xf32>
    %47 = arith.mulf %46, %45 : vector<8x128xf32>
    %cst_28 = arith.constant 5.000000e-01 : f32
    %48 = vector.broadcast %cst_28 : f32 to vector<8x128xf32>
    %49 = arith.addf %47, %48 : vector<8x128xf32>
    %50 = arith.mulf %39, %15 : vector<8x128xf32>
    %51 = arith.mulf %31, %41 : vector<8x128xf32>
    %52 = arith.addf %50, %51 : vector<8x128xf32>
    %53 = math.tanh %52 : vector<8x128xf32>
    %54 = arith.mulf %49, %53 : vector<8x128xf32>
    %55 = arith.addi %13, %c0_i32_14 : i32
    %c8_i32_29 = arith.constant 8 : i32
    %56 = arith.cmpi slt, %55, %c8_i32_29 : i32
    %57 = arith.select %56, %54, %14 : vector<8x128xf32>
    %58 = arith.select %56, %52, %15 : vector<8x128xf32>
    %c1_i32 = arith.constant 1 : i32
    %59 = arith.index_cast %c1_i32 : i32 to index
    %c0_30 = arith.constant 0 : index
    %c0_31 = arith.constant 0 : index
    %60 = vector.load %arg8[%59, %c0_30, %c0_31] : memref<8x8x512xbf16, #tpu.memory_space<vmem>>, vector<1x8x512xbf16>
    %61 = vector.shape_cast %60 : vector<1x8x512xbf16> to vector<8x512xbf16>
    %62 = arith.extf %61 : vector<8x512xbf16> to vector<8x512xf32>
    %63 = arith.truncf %57 : vector<8x128xf32> to vector<8x128xbf16>
    %c0_32 = arith.constant 0 : index
    %c0_33 = arith.constant 0 : index
    %64 = vector.load %arg3[%c0_32, %c0_33] : memref<128x512xbf16, #tpu.memory_space<vmem>>, vector<128x512xbf16>
    %cst_34 = arith.constant dense<0.000000e+00> : vector<8x512xf32>
    %65 = tpu.matmul %63, %64, %cst_34 {dimension_numbers = #tpu.dot_dimension_numbers<[1], [0], [0], [1], [0, 0, 1, 1], [], []>} : vector<8x128xbf16>, vector<128x512xbf16>, vector<8x512xf32> -> vector<8x512xf32>
    %66 = arith.addf %62, %65 : vector<8x512xf32>
    %67 = vector.extract_strided_slice %66 {offsets = [0, 0], sizes = [8, 128], strides = [1, 1]} : vector<8x512xf32> to vector<8x128xf32>
    %cst_35 = arith.constant 5.000000e-01 : f32
    %68 = vector.broadcast %cst_35 : f32 to vector<8x128xf32>
    %69 = arith.mulf %68, %67 : vector<8x128xf32>
    %70 = math.tanh %69 : vector<8x128xf32>
    %cst_36 = arith.constant 5.000000e-01 : f32
    %71 = vector.broadcast %cst_36 : f32 to vector<8x128xf32>
    %72 = arith.mulf %71, %70 : vector<8x128xf32>
    %cst_37 = arith.constant 5.000000e-01 : f32
    %73 = vector.broadcast %cst_37 : f32 to vector<8x128xf32>
    %74 = arith.addf %72, %73 : vector<8x128xf32>
    %75 = vector.extract_strided_slice %66 {offsets = [0, 128], sizes = [8, 128], strides = [1, 1]} : vector<8x512xf32> to vector<8x128xf32>
    %cst_38 = arith.constant 5.000000e-01 : f32
    %76 = vector.broadcast %cst_38 : f32 to vector<8x128xf32>
    %77 = arith.mulf %76, %75 : vector<8x128xf32>
    %78 = math.tanh %77 : vector<8x128xf32>
    %cst_39 = arith.constant 5.000000e-01 : f32
    %79 = vector.broadcast %cst_39 : f32 to vector<8x128xf32>
    %80 = arith.mulf %79, %78 : vector<8x128xf32>
    %cst_40 = arith.constant 5.000000e-01 : f32
    %81 = vector.broadcast %cst_40 : f32 to vector<8x128xf32>
    %82 = arith.addf %80, %81 : vector<8x128xf32>
    %83 = vector.extract_strided_slice %66 {offsets = [0, 256], sizes = [8, 128], strides = [1, 1]} : vector<8x512xf32> to vector<8x128xf32>
    %84 = math.tanh %83 : vector<8x128xf32>
    %85 = vector.extract_strided_slice %66 {offsets = [0, 384], sizes = [8, 128], strides = [1, 1]} : vector<8x512xf32> to vector<8x128xf32>
    %cst_41 = arith.constant 5.000000e-01 : f32
    %86 = vector.broadcast %cst_41 : f32 to vector<8x128xf32>
    %87 = arith.mulf %86, %85 : vector<8x128xf32>
    %88 = math.tanh %87 : vector<8x128xf32>
    %cst_42 = arith.constant 5.000000e-01 : f32
    %89 = vector.broadcast %cst_42 : f32 to vector<8x128xf32>
    %90 = arith.mulf %89, %88 : vector<8x128xf32>
    %cst_43 = arith.constant 5.000000e-01 : f32
    %91 = vector.broadcast %cst_43 : f32 to vector<8x128xf32>
    %92 = arith.addf %90, %91 : vector<8x128xf32>
    %93 = arith.mulf %82, %58 : vector<8x128xf32>
    %94 = arith.mulf %74, %84 : vector<8x128xf32>
    %95 = arith.addf %93, %94 : vector<8x128xf32>
    %96 = math.tanh %95 : vector<8x128xf32>
    %97 = arith.mulf %92, %96 : vector<8x128xf32>
    %98 = arith.addi %13, %c1_i32 : i32
    %c8_i32_44 = arith.constant 8 : i32
    %99 = arith.cmpi slt, %98, %c8_i32_44 : i32
    %100 = arith.select %99, %97, %57 : vector<8x128xf32>
    %101 = arith.select %99, %95, %58 : vector<8x128xf32>
    %c2_i32 = arith.constant 2 : i32
    %102 = arith.index_cast %c2_i32 : i32 to index
    %c0_45 = arith.constant 0 : index
    %c0_46 = arith.constant 0 : index
    %103 = vector.load %arg8[%102, %c0_45, %c0_46] : memref<8x8x512xbf16, #tpu.memory_space<vmem>>, vector<1x8x512xbf16>
    %104 = vector.shape_cast %103 : vector<1x8x512xbf16> to vector<8x512xbf16>
    %105 = arith.extf %104 : vector<8x512xbf16> to vector<8x512xf32>
    %106 = arith.truncf %100 : vector<8x128xf32> to vector<8x128xbf16>
    %c0_47 = arith.constant 0 : index
    %c0_48 = arith.constant 0 : index
    %107 = vector.load %arg3[%c0_47, %c0_48] : memref<128x512xbf16, #tpu.memory_space<vmem>>, vector<128x512xbf16>
    %cst_49 = arith.constant dense<0.000000e+00> : vector<8x512xf32>
    %108 = tpu.matmul %106, %107, %cst_49 {dimension_numbers = #tpu.dot_dimension_numbers<[1], [0], [0], [1], [0, 0, 1, 1], [], []>} : vector<8x128xbf16>, vector<128x512xbf16>, vector<8x512xf32> -> vector<8x512xf32>
    %109 = arith.addf %105, %108 : vector<8x512xf32>
    %110 = vector.extract_strided_slice %109 {offsets = [0, 0], sizes = [8, 128], strides = [1, 1]} : vector<8x512xf32> to vector<8x128xf32>
    %cst_50 = arith.constant 5.000000e-01 : f32
    %111 = vector.broadcast %cst_50 : f32 to vector<8x128xf32>
    %112 = arith.mulf %111, %110 : vector<8x128xf32>
    %113 = math.tanh %112 : vector<8x128xf32>
    %cst_51 = arith.constant 5.000000e-01 : f32
    %114 = vector.broadcast %cst_51 : f32 to vector<8x128xf32>
    %115 = arith.mulf %114, %113 : vector<8x128xf32>
    %cst_52 = arith.constant 5.000000e-01 : f32
    %116 = vector.broadcast %cst_52 : f32 to vector<8x128xf32>
    %117 = arith.addf %115, %116 : vector<8x128xf32>
    %118 = vector.extract_strided_slice %109 {offsets = [0, 128], sizes = [8, 128], strides = [1, 1]} : vector<8x512xf32> to vector<8x128xf32>
    %cst_53 = arith.constant 5.000000e-01 : f32
    %119 = vector.broadcast %cst_53 : f32 to vector<8x128xf32>
    %120 = arith.mulf %119, %118 : vector<8x128xf32>
    %121 = math.tanh %120 : vector<8x128xf32>
    %cst_54 = arith.constant 5.000000e-01 : f32
    %122 = vector.broadcast %cst_54 : f32 to vector<8x128xf32>
    %123 = arith.mulf %122, %121 : vector<8x128xf32>
    %cst_55 = arith.constant 5.000000e-01 : f32
    %124 = vector.broadcast %cst_55 : f32 to vector<8x128xf32>
    %125 = arith.addf %123, %124 : vector<8x128xf32>
    %126 = vector.extract_strided_slice %109 {offsets = [0, 256], sizes = [8, 128], strides = [1, 1]} : vector<8x512xf32> to vector<8x128xf32>
    %127 = math.tanh %126 : vector<8x128xf32>
    %128 = vector.extract_strided_slice %109 {offsets = [0, 384], sizes = [8, 128], strides = [1, 1]} : vector<8x512xf32> to vector<8x128xf32>
    %cst_56 = arith.constant 5.000000e-01 : f32
    %129 = vector.broadcast %cst_56 : f32 to vector<8x128xf32>
    %130 = arith.mulf %129, %128 : vector<8x128xf32>
    %131 = math.tanh %130 : vector<8x128xf32>
    %cst_57 = arith.constant 5.000000e-01 : f32
    %132 = vector.broadcast %cst_57 : f32 to vector<8x128xf32>
    %133 = arith.mulf %132, %131 : vector<8x128xf32>
    %cst_58 = arith.constant 5.000000e-01 : f32
    %134 = vector.broadcast %cst_58 : f32 to vector<8x128xf32>
    %135 = arith.addf %133, %134 : vector<8x128xf32>
    %136 = arith.mulf %125, %101 : vector<8x128xf32>
    %137 = arith.mulf %117, %127 : vector<8x128xf32>
    %138 = arith.addf %136, %137 : vector<8x128xf32>
    %139 = math.tanh %138 : vector<8x128xf32>
    %140 = arith.mulf %135, %139 : vector<8x128xf32>
    %141 = arith.addi %13, %c2_i32 : i32
    %c8_i32_59 = arith.constant 8 : i32
    %142 = arith.cmpi slt, %141, %c8_i32_59 : i32
    %143 = arith.select %142, %140, %100 : vector<8x128xf32>
    %144 = arith.select %142, %138, %101 : vector<8x128xf32>
    %c3_i32 = arith.constant 3 : i32
    %145 = arith.index_cast %c3_i32 : i32 to index
    %c0_60 = arith.constant 0 : index
    %c0_61 = arith.constant 0 : index
    %146 = vector.load %arg8[%145, %c0_60, %c0_61] : memref<8x8x512xbf16, #tpu.memory_space<vmem>>, vector<1x8x512xbf16>
    %147 = vector.shape_cast %146 : vector<1x8x512xbf16> to vector<8x512xbf16>
    %148 = arith.extf %147 : vector<8x512xbf16> to vector<8x512xf32>
    %149 = arith.truncf %143 : vector<8x128xf32> to vector<8x128xbf16>
    %c0_62 = arith.constant 0 : index
    %c0_63 = arith.constant 0 : index
    %150 = vector.load %arg3[%c0_62, %c0_63] : memref<128x512xbf16, #tpu.memory_space<vmem>>, vector<128x512xbf16>
    %cst_64 = arith.constant dense<0.000000e+00> : vector<8x512xf32>
    %151 = tpu.matmul %149, %150, %cst_64 {dimension_numbers = #tpu.dot_dimension_numbers<[1], [0], [0], [1], [0, 0, 1, 1], [], []>} : vector<8x128xbf16>, vector<128x512xbf16>, vector<8x512xf32> -> vector<8x512xf32>
    %152 = arith.addf %148, %151 : vector<8x512xf32>
    %153 = vector.extract_strided_slice %152 {offsets = [0, 0], sizes = [8, 128], strides = [1, 1]} : vector<8x512xf32> to vector<8x128xf32>
    %cst_65 = arith.constant 5.000000e-01 : f32
    %154 = vector.broadcast %cst_65 : f32 to vector<8x128xf32>
    %155 = arith.mulf %154, %153 : vector<8x128xf32>
    %156 = math.tanh %155 : vector<8x128xf32>
    %cst_66 = arith.constant 5.000000e-01 : f32
    %157 = vector.broadcast %cst_66 : f32 to vector<8x128xf32>
    %158 = arith.mulf %157, %156 : vector<8x128xf32>
    %cst_67 = arith.constant 5.000000e-01 : f32
    %159 = vector.broadcast %cst_67 : f32 to vector<8x128xf32>
    %160 = arith.addf %158, %159 : vector<8x128xf32>
    %161 = vector.extract_strided_slice %152 {offsets = [0, 128], sizes = [8, 128], strides = [1, 1]} : vector<8x512xf32> to vector<8x128xf32>
    %cst_68 = arith.constant 5.000000e-01 : f32
    %162 = vector.broadcast %cst_68 : f32 to vector<8x128xf32>
    %163 = arith.mulf %162, %161 : vector<8x128xf32>
    %164 = math.tanh %163 : vector<8x128xf32>
    %cst_69 = arith.constant 5.000000e-01 : f32
    %165 = vector.broadcast %cst_69 : f32 to vector<8x128xf32>
    %166 = arith.mulf %165, %164 : vector<8x128xf32>
    %cst_70 = arith.constant 5.000000e-01 : f32
    %167 = vector.broadcast %cst_70 : f32 to vector<8x128xf32>
    %168 = arith.addf %166, %167 : vector<8x128xf32>
    %169 = vector.extract_strided_slice %152 {offsets = [0, 256], sizes = [8, 128], strides = [1, 1]} : vector<8x512xf32> to vector<8x128xf32>
    %170 = math.tanh %169 : vector<8x128xf32>
    %171 = vector.extract_strided_slice %152 {offsets = [0, 384], sizes = [8, 128], strides = [1, 1]} : vector<8x512xf32> to vector<8x128xf32>
    %cst_71 = arith.constant 5.000000e-01 : f32
    %172 = vector.broadcast %cst_71 : f32 to vector<8x128xf32>
    %173 = arith.mulf %172, %171 : vector<8x128xf32>
    %174 = math.tanh %173 : vector<8x128xf32>
    %cst_72 = arith.constant 5.000000e-01 : f32
    %175 = vector.broadcast %cst_72 : f32 to vector<8x128xf32>
    %176 = arith.mulf %175, %174 : vector<8x128xf32>
    %cst_73 = arith.constant 5.000000e-01 : f32
    %177 = vector.broadcast %cst_73 : f32 to vector<8x128xf32>
    %178 = arith.addf %176, %177 : vector<8x128xf32>
    %179 = arith.mulf %168, %144 : vector<8x128xf32>
    %180 = arith.mulf %160, %170 : vector<8x128xf32>
    %181 = arith.addf %179, %180 : vector<8x128xf32>
    %182 = math.tanh %181 : vector<8x128xf32>
    %183 = arith.mulf %178, %182 : vector<8x128xf32>
    %184 = arith.addi %13, %c3_i32 : i32
    %c8_i32_74 = arith.constant 8 : i32
    %185 = arith.cmpi slt, %184, %c8_i32_74 : i32
    %186 = arith.select %185, %183, %143 : vector<8x128xf32>
    %187 = arith.select %185, %181, %144 : vector<8x128xf32>
    %c4_i32 = arith.constant 4 : i32
    %188 = arith.index_cast %c4_i32 : i32 to index
    %c0_75 = arith.constant 0 : index
    %c0_76 = arith.constant 0 : index
    %189 = vector.load %arg8[%188, %c0_75, %c0_76] : memref<8x8x512xbf16, #tpu.memory_space<vmem>>, vector<1x8x512xbf16>
    %190 = vector.shape_cast %189 : vector<1x8x512xbf16> to vector<8x512xbf16>
    %191 = arith.extf %190 : vector<8x512xbf16> to vector<8x512xf32>
    %192 = arith.truncf %186 : vector<8x128xf32> to vector<8x128xbf16>
    %c0_77 = arith.constant 0 : index
    %c0_78 = arith.constant 0 : index
    %193 = vector.load %arg3[%c0_77, %c0_78] : memref<128x512xbf16, #tpu.memory_space<vmem>>, vector<128x512xbf16>
    %cst_79 = arith.constant dense<0.000000e+00> : vector<8x512xf32>
    %194 = tpu.matmul %192, %193, %cst_79 {dimension_numbers = #tpu.dot_dimension_numbers<[1], [0], [0], [1], [0, 0, 1, 1], [], []>} : vector<8x128xbf16>, vector<128x512xbf16>, vector<8x512xf32> -> vector<8x512xf32>
    %195 = arith.addf %191, %194 : vector<8x512xf32>
    %196 = vector.extract_strided_slice %195 {offsets = [0, 0], sizes = [8, 128], strides = [1, 1]} : vector<8x512xf32> to vector<8x128xf32>
    %cst_80 = arith.constant 5.000000e-01 : f32
    %197 = vector.broadcast %cst_80 : f32 to vector<8x128xf32>
    %198 = arith.mulf %197, %196 : vector<8x128xf32>
    %199 = math.tanh %198 : vector<8x128xf32>
    %cst_81 = arith.constant 5.000000e-01 : f32
    %200 = vector.broadcast %cst_81 : f32 to vector<8x128xf32>
    %201 = arith.mulf %200, %199 : vector<8x128xf32>
    %cst_82 = arith.constant 5.000000e-01 : f32
    %202 = vector.broadcast %cst_82 : f32 to vector<8x128xf32>
    %203 = arith.addf %201, %202 : vector<8x128xf32>
    %204 = vector.extract_strided_slice %195 {offsets = [0, 128], sizes = [8, 128], strides = [1, 1]} : vector<8x512xf32> to vector<8x128xf32>
    %cst_83 = arith.constant 5.000000e-01 : f32
    %205 = vector.broadcast %cst_83 : f32 to vector<8x128xf32>
    %206 = arith.mulf %205, %204 : vector<8x128xf32>
    %207 = math.tanh %206 : vector<8x128xf32>
    %cst_84 = arith.constant 5.000000e-01 : f32
    %208 = vector.broadcast %cst_84 : f32 to vector<8x128xf32>
    %209 = arith.mulf %208, %207 : vector<8x128xf32>
    %cst_85 = arith.constant 5.000000e-01 : f32
    %210 = vector.broadcast %cst_85 : f32 to vector<8x128xf32>
    %211 = arith.addf %209, %210 : vector<8x128xf32>
    %212 = vector.extract_strided_slice %195 {offsets = [0, 256], sizes = [8, 128], strides = [1, 1]} : vector<8x512xf32> to vector<8x128xf32>
    %213 = math.tanh %212 : vector<8x128xf32>
    %214 = vector.extract_strided_slice %195 {offsets = [0, 384], sizes = [8, 128], strides = [1, 1]} : vector<8x512xf32> to vector<8x128xf32>
    %cst_86 = arith.constant 5.000000e-01 : f32
    %215 = vector.broadcast %cst_86 : f32 to vector<8x128xf32>
    %216 = arith.mulf %215, %214 : vector<8x128xf32>
    %217 = math.tanh %216 : vector<8x128xf32>
    %cst_87 = arith.constant 5.000000e-01 : f32
    %218 = vector.broadcast %cst_87 : f32 to vector<8x128xf32>
    %219 = arith.mulf %218, %217 : vector<8x128xf32>
    %cst_88 = arith.constant 5.000000e-01 : f32
    %220 = vector.broadcast %cst_88 : f32 to vector<8x128xf32>
    %221 = arith.addf %219, %220 : vector<8x128xf32>
    %222 = arith.mulf %211, %187 : vector<8x128xf32>
    %223 = arith.mulf %203, %213 : vector<8x128xf32>
    %224 = arith.addf %222, %223 : vector<8x128xf32>
    %225 = math.tanh %224 : vector<8x128xf32>
    %226 = arith.mulf %221, %225 : vector<8x128xf32>
    %227 = arith.addi %13, %c4_i32 : i32
    %c8_i32_89 = arith.constant 8 : i32
    %228 = arith.cmpi slt, %227, %c8_i32_89 : i32
    %229 = arith.select %228, %226, %186 : vector<8x128xf32>
    %230 = arith.select %228, %224, %187 : vector<8x128xf32>
    %c5_i32 = arith.constant 5 : i32
    %231 = arith.index_cast %c5_i32 : i32 to index
    %c0_90 = arith.constant 0 : index
    %c0_91 = arith.constant 0 : index
    %232 = vector.load %arg8[%231, %c0_90, %c0_91] : memref<8x8x512xbf16, #tpu.memory_space<vmem>>, vector<1x8x512xbf16>
    %233 = vector.shape_cast %232 : vector<1x8x512xbf16> to vector<8x512xbf16>
    %234 = arith.extf %233 : vector<8x512xbf16> to vector<8x512xf32>
    %235 = arith.truncf %229 : vector<8x128xf32> to vector<8x128xbf16>
    %c0_92 = arith.constant 0 : index
    %c0_93 = arith.constant 0 : index
    %236 = vector.load %arg3[%c0_92, %c0_93] : memref<128x512xbf16, #tpu.memory_space<vmem>>, vector<128x512xbf16>
    %cst_94 = arith.constant dense<0.000000e+00> : vector<8x512xf32>
    %237 = tpu.matmul %235, %236, %cst_94 {dimension_numbers = #tpu.dot_dimension_numbers<[1], [0], [0], [1], [0, 0, 1, 1], [], []>} : vector<8x128xbf16>, vector<128x512xbf16>, vector<8x512xf32> -> vector<8x512xf32>
    %238 = arith.addf %234, %237 : vector<8x512xf32>
    %239 = vector.extract_strided_slice %238 {offsets = [0, 0], sizes = [8, 128], strides = [1, 1]} : vector<8x512xf32> to vector<8x128xf32>
    %cst_95 = arith.constant 5.000000e-01 : f32
    %240 = vector.broadcast %cst_95 : f32 to vector<8x128xf32>
    %241 = arith.mulf %240, %239 : vector<8x128xf32>
    %242 = math.tanh %241 : vector<8x128xf32>
    %cst_96 = arith.constant 5.000000e-01 : f32
    %243 = vector.broadcast %cst_96 : f32 to vector<8x128xf32>
    %244 = arith.mulf %243, %242 : vector<8x128xf32>
    %cst_97 = arith.constant 5.000000e-01 : f32
    %245 = vector.broadcast %cst_97 : f32 to vector<8x128xf32>
    %246 = arith.addf %244, %245 : vector<8x128xf32>
    %247 = vector.extract_strided_slice %238 {offsets = [0, 128], sizes = [8, 128], strides = [1, 1]} : vector<8x512xf32> to vector<8x128xf32>
    %cst_98 = arith.constant 5.000000e-01 : f32
    %248 = vector.broadcast %cst_98 : f32 to vector<8x128xf32>
    %249 = arith.mulf %248, %247 : vector<8x128xf32>
    %250 = math.tanh %249 : vector<8x128xf32>
    %cst_99 = arith.constant 5.000000e-01 : f32
    %251 = vector.broadcast %cst_99 : f32 to vector<8x128xf32>
    %252 = arith.mulf %251, %250 : vector<8x128xf32>
    %cst_100 = arith.constant 5.000000e-01 : f32
    %253 = vector.broadcast %cst_100 : f32 to vector<8x128xf32>
    %254 = arith.addf %252, %253 : vector<8x128xf32>
    %255 = vector.extract_strided_slice %238 {offsets = [0, 256], sizes = [8, 128], strides = [1, 1]} : vector<8x512xf32> to vector<8x128xf32>
    %256 = math.tanh %255 : vector<8x128xf32>
    %257 = vector.extract_strided_slice %238 {offsets = [0, 384], sizes = [8, 128], strides = [1, 1]} : vector<8x512xf32> to vector<8x128xf32>
    %cst_101 = arith.constant 5.000000e-01 : f32
    %258 = vector.broadcast %cst_101 : f32 to vector<8x128xf32>
    %259 = arith.mulf %258, %257 : vector<8x128xf32>
    %260 = math.tanh %259 : vector<8x128xf32>
    %cst_102 = arith.constant 5.000000e-01 : f32
    %261 = vector.broadcast %cst_102 : f32 to vector<8x128xf32>
    %262 = arith.mulf %261, %260 : vector<8x128xf32>
    %cst_103 = arith.constant 5.000000e-01 : f32
    %263 = vector.broadcast %cst_103 : f32 to vector<8x128xf32>
    %264 = arith.addf %262, %263 : vector<8x128xf32>
    %265 = arith.mulf %254, %230 : vector<8x128xf32>
    %266 = arith.mulf %246, %256 : vector<8x128xf32>
    %267 = arith.addf %265, %266 : vector<8x128xf32>
    %268 = math.tanh %267 : vector<8x128xf32>
    %269 = arith.mulf %264, %268 : vector<8x128xf32>
    %270 = arith.addi %13, %c5_i32 : i32
    %c8_i32_104 = arith.constant 8 : i32
    %271 = arith.cmpi slt, %270, %c8_i32_104 : i32
    %272 = arith.select %271, %269, %229 : vector<8x128xf32>
    %273 = arith.select %271, %267, %230 : vector<8x128xf32>
    %c6_i32 = arith.constant 6 : i32
    %274 = arith.index_cast %c6_i32 : i32 to index
    %c0_105 = arith.constant 0 : index
    %c0_106 = arith.constant 0 : index
    %275 = vector.load %arg8[%274, %c0_105, %c0_106] : memref<8x8x512xbf16, #tpu.memory_space<vmem>>, vector<1x8x512xbf16>
    %276 = vector.shape_cast %275 : vector<1x8x512xbf16> to vector<8x512xbf16>
    %277 = arith.extf %276 : vector<8x512xbf16> to vector<8x512xf32>
    %278 = arith.truncf %272 : vector<8x128xf32> to vector<8x128xbf16>
    %c0_107 = arith.constant 0 : index
    %c0_108 = arith.constant 0 : index
    %279 = vector.load %arg3[%c0_107, %c0_108] : memref<128x512xbf16, #tpu.memory_space<vmem>>, vector<128x512xbf16>
    %cst_109 = arith.constant dense<0.000000e+00> : vector<8x512xf32>
    %280 = tpu.matmul %278, %279, %cst_109 {dimension_numbers = #tpu.dot_dimension_numbers<[1], [0], [0], [1], [0, 0, 1, 1], [], []>} : vector<8x128xbf16>, vector<128x512xbf16>, vector<8x512xf32> -> vector<8x512xf32>
    %281 = arith.addf %277, %280 : vector<8x512xf32>
    %282 = vector.extract_strided_slice %281 {offsets = [0, 0], sizes = [8, 128], strides = [1, 1]} : vector<8x512xf32> to vector<8x128xf32>
    %cst_110 = arith.constant 5.000000e-01 : f32
    %283 = vector.broadcast %cst_110 : f32 to vector<8x128xf32>
    %284 = arith.mulf %283, %282 : vector<8x128xf32>
    %285 = math.tanh %284 : vector<8x128xf32>
    %cst_111 = arith.constant 5.000000e-01 : f32
    %286 = vector.broadcast %cst_111 : f32 to vector<8x128xf32>
    %287 = arith.mulf %286, %285 : vector<8x128xf32>
    %cst_112 = arith.constant 5.000000e-01 : f32
    %288 = vector.broadcast %cst_112 : f32 to vector<8x128xf32>
    %289 = arith.addf %287, %288 : vector<8x128xf32>
    %290 = vector.extract_strided_slice %281 {offsets = [0, 128], sizes = [8, 128], strides = [1, 1]} : vector<8x512xf32> to vector<8x128xf32>
    %cst_113 = arith.constant 5.000000e-01 : f32
    %291 = vector.broadcast %cst_113 : f32 to vector<8x128xf32>
    %292 = arith.mulf %291, %290 : vector<8x128xf32>
    %293 = math.tanh %292 : vector<8x128xf32>
    %cst_114 = arith.constant 5.000000e-01 : f32
    %294 = vector.broadcast %cst_114 : f32 to vector<8x128xf32>
    %295 = arith.mulf %294, %293 : vector<8x128xf32>
    %cst_115 = arith.constant 5.000000e-01 : f32
    %296 = vector.broadcast %cst_115 : f32 to vector<8x128xf32>
    %297 = arith.addf %295, %296 : vector<8x128xf32>
    %298 = vector.extract_strided_slice %281 {offsets = [0, 256], sizes = [8, 128], strides = [1, 1]} : vector<8x512xf32> to vector<8x128xf32>
    %299 = math.tanh %298 : vector<8x128xf32>
    %300 = vector.extract_strided_slice %281 {offsets = [0, 384], sizes = [8, 128], strides = [1, 1]} : vector<8x512xf32> to vector<8x128xf32>
    %cst_116 = arith.constant 5.000000e-01 : f32
    %301 = vector.broadcast %cst_116 : f32 to vector<8x128xf32>
    %302 = arith.mulf %301, %300 : vector<8x128xf32>
    %303 = math.tanh %302 : vector<8x128xf32>
    %cst_117 = arith.constant 5.000000e-01 : f32
    %304 = vector.broadcast %cst_117 : f32 to vector<8x128xf32>
    %305 = arith.mulf %304, %303 : vector<8x128xf32>
    %cst_118 = arith.constant 5.000000e-01 : f32
    %306 = vector.broadcast %cst_118 : f32 to vector<8x128xf32>
    %307 = arith.addf %305, %306 : vector<8x128xf32>
    %308 = arith.mulf %297, %273 : vector<8x128xf32>
    %309 = arith.mulf %289, %299 : vector<8x128xf32>
    %310 = arith.addf %308, %309 : vector<8x128xf32>
    %311 = math.tanh %310 : vector<8x128xf32>
    %312 = arith.mulf %307, %311 : vector<8x128xf32>
    %313 = arith.addi %13, %c6_i32 : i32
    %c8_i32_119 = arith.constant 8 : i32
    %314 = arith.cmpi slt, %313, %c8_i32_119 : i32
    %315 = arith.select %314, %312, %272 : vector<8x128xf32>
    %316 = arith.select %314, %310, %273 : vector<8x128xf32>
    %c7_i32 = arith.constant 7 : i32
    %317 = arith.index_cast %c7_i32 : i32 to index
    %c0_120 = arith.constant 0 : index
    %c0_121 = arith.constant 0 : index
    %318 = vector.load %arg8[%317, %c0_120, %c0_121] : memref<8x8x512xbf16, #tpu.memory_space<vmem>>, vector<1x8x512xbf16>
    %319 = vector.shape_cast %318 : vector<1x8x512xbf16> to vector<8x512xbf16>
    %320 = arith.extf %319 : vector<8x512xbf16> to vector<8x512xf32>
    %321 = arith.truncf %315 : vector<8x128xf32> to vector<8x128xbf16>
    %c0_122 = arith.constant 0 : index
    %c0_123 = arith.constant 0 : index
    %322 = vector.load %arg3[%c0_122, %c0_123] : memref<128x512xbf16, #tpu.memory_space<vmem>>, vector<128x512xbf16>
    %cst_124 = arith.constant dense<0.000000e+00> : vector<8x512xf32>
    %323 = tpu.matmul %321, %322, %cst_124 {dimension_numbers = #tpu.dot_dimension_numbers<[1], [0], [0], [1], [0, 0, 1, 1], [], []>} : vector<8x128xbf16>, vector<128x512xbf16>, vector<8x512xf32> -> vector<8x512xf32>
    %324 = arith.addf %320, %323 : vector<8x512xf32>
    %325 = vector.extract_strided_slice %324 {offsets = [0, 0], sizes = [8, 128], strides = [1, 1]} : vector<8x512xf32> to vector<8x128xf32>
    %cst_125 = arith.constant 5.000000e-01 : f32
    %326 = vector.broadcast %cst_125 : f32 to vector<8x128xf32>
    %327 = arith.mulf %326, %325 : vector<8x128xf32>
    %328 = math.tanh %327 : vector<8x128xf32>
    %cst_126 = arith.constant 5.000000e-01 : f32
    %329 = vector.broadcast %cst_126 : f32 to vector<8x128xf32>
    %330 = arith.mulf %329, %328 : vector<8x128xf32>
    %cst_127 = arith.constant 5.000000e-01 : f32
    %331 = vector.broadcast %cst_127 : f32 to vector<8x128xf32>
    %332 = arith.addf %330, %331 : vector<8x128xf32>
    %333 = vector.extract_strided_slice %324 {offsets = [0, 128], sizes = [8, 128], strides = [1, 1]} : vector<8x512xf32> to vector<8x128xf32>
    %cst_128 = arith.constant 5.000000e-01 : f32
    %334 = vector.broadcast %cst_128 : f32 to vector<8x128xf32>
    %335 = arith.mulf %334, %333 : vector<8x128xf32>
    %336 = math.tanh %335 : vector<8x128xf32>
    %cst_129 = arith.constant 5.000000e-01 : f32
    %337 = vector.broadcast %cst_129 : f32 to vector<8x128xf32>
    %338 = arith.mulf %337, %336 : vector<8x128xf32>
    %cst_130 = arith.constant 5.000000e-01 : f32
    %339 = vector.broadcast %cst_130 : f32 to vector<8x128xf32>
    %340 = arith.addf %338, %339 : vector<8x128xf32>
    %341 = vector.extract_strided_slice %324 {offsets = [0, 256], sizes = [8, 128], strides = [1, 1]} : vector<8x512xf32> to vector<8x128xf32>
    %342 = math.tanh %341 : vector<8x128xf32>
    %343 = vector.extract_strided_slice %324 {offsets = [0, 384], sizes = [8, 128], strides = [1, 1]} : vector<8x512xf32> to vector<8x128xf32>
    %cst_131 = arith.constant 5.000000e-01 : f32
    %344 = vector.broadcast %cst_131 : f32 to vector<8x128xf32>
    %345 = arith.mulf %344, %343 : vector<8x128xf32>
    %346 = math.tanh %345 : vector<8x128xf32>
    %cst_132 = arith.constant 5.000000e-01 : f32
    %347 = vector.broadcast %cst_132 : f32 to vector<8x128xf32>
    %348 = arith.mulf %347, %346 : vector<8x128xf32>
    %cst_133 = arith.constant 5.000000e-01 : f32
    %349 = vector.broadcast %cst_133 : f32 to vector<8x128xf32>
    %350 = arith.addf %348, %349 : vector<8x128xf32>
    %351 = arith.mulf %340, %316 : vector<8x128xf32>
    %352 = arith.mulf %332, %342 : vector<8x128xf32>
    %353 = arith.addf %351, %352 : vector<8x128xf32>
    %354 = math.tanh %353 : vector<8x128xf32>
    %355 = arith.mulf %350, %354 : vector<8x128xf32>
    %356 = arith.addi %13, %c7_i32 : i32
    %c8_i32_134 = arith.constant 8 : i32
    %357 = arith.cmpi slt, %356, %c8_i32_134 : i32
    %358 = arith.select %357, %355, %315 : vector<8x128xf32>
    %359 = arith.select %357, %353, %316 : vector<8x128xf32>
    %c8_i32_135 = arith.constant 8 : i32
    %c0_136 = arith.constant 0 : index
    %c0_137 = arith.constant 0 : index
    %360 = vector.load %arg9[%c0_136, %c0_137] : memref<8x128xf32, #tpu.memory_space<vmem>>, vector<8x128xf32>
    tpu.vector_store %arg9[%c0_136, %c0_137], %358 {strides = array<i32>} : memref<8x128xf32, #tpu.memory_space<vmem>>, vector<8x128xf32>,
    %c0_138 = arith.constant 0 : index
    %c0_139 = arith.constant 0 : index
    %361 = vector.load %arg10[%c0_138, %c0_139] : memref<8x128xf32, #tpu.memory_space<vmem>>, vector<8x128xf32>
    tpu.vector_store %arg10[%c0_138, %c0_139], %359 {strides = array<i32>} : memref<8x128xf32, #tpu.memory_space<vmem>>, vector<8x128xf32>,
    %c0_i32_140 = arith.constant 0 : i32
    %362 = arith.cmpi eq, %arg0, %c0_i32_140 : i32
    %363 = arith.extui %362 : i1 to i32
    %c0_i32_141 = arith.constant 0 : i32
    %364 = arith.cmpi ne, %363, %c0_i32_141 : i32
    scf.if %364 {
      %365 = arith.truncf %358 : vector<8x128xf32> to vector<8x128xbf16>
      %c0_142 = arith.constant 0 : index
      %c0_143 = arith.constant 0 : index
      %366 = vector.load %arg5[%c0_142, %c0_143] : memref<128x4xbf16, #tpu.memory_space<vmem>>, vector<128x4xbf16>
      %cst_144 = arith.constant dense<0.000000e+00> : vector<8x4xf32>
      %367 = tpu.matmul %365, %366, %cst_144 {dimension_numbers = #tpu.dot_dimension_numbers<[1], [0], [0], [1], [0, 0, 1, 1], [], []>} : vector<8x128xbf16>, vector<128x4xbf16>, vector<8x4xf32> -> vector<8x4xf32>
      %c0_145 = arith.constant 0 : index
      %c0_146 = arith.constant 0 : index
      %368 = vector.load %arg6[%c0_145, %c0_146] : memref<1x4xf32, #tpu.memory_space<vmem>>, vector<1x4xf32>
      %369 = vector.broadcast %368 : vector<1x4xf32> to vector<8x4xf32>
      %370 = arith.addf %367, %369 : vector<8x4xf32>
      %c0_147 = arith.constant 0 : index
      %c0_148 = arith.constant 0 : index
      %371 = vector.load %arg7[%c0_147, %c0_148] : memref<8x4xf32, #tpu.memory_space<vmem>>, vector<8x4xf32>
      tpu.vector_store %arg7[%c0_147, %c0_148], %370 {strides = array<i32>} : memref<8x4xf32, #tpu.memory_space<vmem>>, vector<8x4xf32>,
    } else {
    }
    return
  }
  func.func @transform_0(%arg0: i32) -> (i32, i32, i32) {
    %c0_i32 = arith.constant 0 : i32
    %c0_i32_0 = arith.constant 0 : i32
    %c0_i32_1 = arith.constant 0 : i32
    return %arg0, %c0_i32, %c0_i32_0 : i32, i32, i32
  }
  func.func @transform_1(%arg0: i32) -> (i32, i32) {
    %c0_i32 = arith.constant 0 : i32
    %c0_i32_0 = arith.constant 0 : i32
    %c0_i32_1 = arith.constant 0 : i32
    return %c0_i32, %c0_i32_0 : i32, i32
  }
  func.func @transform_2(%arg0: i32) -> (i32, i32) {
    %c0_i32 = arith.constant 0 : i32
    %c0_i32_0 = arith.constant 0 : i32
    %c0_i32_1 = arith.constant 0 : i32
    return %c0_i32, %c0_i32_0 : i32, i32
  }
  func.func @transform_3(%arg0: i32) -> (i32, i32) {
    %c0_i32 = arith.constant 0 : i32
    %c0_i32_0 = arith.constant 0 : i32
    %c0_i32_1 = arith.constant 0 : i32
    return %c0_i32, %c0_i32_0 : i32, i32
  }
  func.func @transform_4(%arg0: i32) -> (i32, i32) {
    %c0_i32 = arith.constant 0 : i32
    %c0_i32_0 = arith.constant 0 : i32
    %c0_i32_1 = arith.constant 0 : i32
    return %c0_i32, %c0_i32_0 : i32, i32
  }
  func.func @transform_5(%arg0: i32) -> (i32, i32) {
    %c0_i32 = arith.constant 0 : i32
    %c0_i32_0 = arith.constant 0 : i32
    %c0_i32_1 = arith.constant 0 : i32
    return %c0_i32, %c0_i32_0 : i32, i32
  }
  func.func @transform_6(%arg0: i32) -> (i32, i32) {
    %c0_i32 = arith.constant 0 : i32
    %c0_i32_0 = arith.constant 0 : i32
    %c0_i32_1 = arith.constant 0 : i32
    return %c0_i32, %c0_i32_0 : i32, i32
  }
}

</mosaic_0001>

<bundles_post_ra>
// kernel: tpu_custom_call.1
= control target key start
LH: loop header
LB: loop body
LE: loop exit
PB: predicated region body
PF: predicated region fallthrough
CT: control target
= control target key end

     0   :  { %11 = vsyncpa [#allocation6], 0  ;;  %s2270_s0 = inlined_call_operand.vmem [shape: bf16[8,8,16], index: 0, kind: input, shape index: {}]   ;;  %s2271_s1 = inlined_call_operand.vmem [shape: bf16[16,512], index: 1, kind: input, shape index: {}]   ;;  %s2272_s2 = inlined_call_operand.hbm [shape: bf16[128,512], index: 2, kind: input, shape index: {}]   ;;  %s2273_s3 = inlined_call_operand.hbm [shape: f32[1,512], index: 3, kind: input, shape index: {}]   ;;  %s2274_s4 = inlined_call_operand.vmem [shape: bf16[128,4], index: 4, kind: input, shape index: {}]   ;;  %s2275_s5 = inlined_call_operand.vmem [shape: f32[1,4], index: 5, kind: input, shape index: {}]   ;;  %s2276_s6 = inlined_call_operand.vmem [shape: f32[8,4], index: 6, kind: output, shape index: {}]  }
   0x1   :  { %s21_s23 = sshll.u32 %s2272_s2, 4  ;;  %s22_s23 = int_to_ptr.hbm [resolvable:$true] %s21_s23 }
   0x2   :  { %12 = vsyncpa [#allocation8], 0  ;;  %s1678_s24 = smov [#allocation5]   ;;  %s35_s28 = sshll.u32 %s2273_s3, 4  ;;  %s36_s28 = int_to_ptr.hbm [resolvable:$true] %s35_s28 }
   0x3   :  { %s23_s25 = sshll.u32 %s1678_s24, 4  ;;  %s1679_s29 = smov 256   ;;  %s24_s25 = int_to_ptr.vmem [resolvable:$true] %s23_s25 }
   0x4   :  { %s1680_s30 = smov 16   ;;  %s1681_s7 = smov [#allocation7]  }
   0x5   :  { %29 = dma.hbm_to_vmem [thread:$0]  %s22_s23, 4096, %s24_s25, [#allocation6], %s1679_s29, %s1679_s29, %s1680_s30  }
   0x6   :  { %s37_s8 = sshll.u32 %s1681_s7, 4  ;;  %s38_s8 = int_to_ptr.vmem [resolvable:$true] %s37_s8 }
   0x7   :  { %40 = dma.hbm_to_vmem [thread:$0]  %s36_s28, 64, %s38_s8, [#allocation8]  }
   0x8   :  { %1674 = dma.done.wait [#allocation6], 4096  }
   0x9   :  { %1675 = vsyncadd [#allocation6], 4294963200 }
   0xa   :  { %1676 = dma.done.wait [#allocation8], 64  }
   0xb   :  { %1677 = vsyncadd [#allocation8], 4294967232  ;;  %v1301_v0 = vld [vmem:[%s2271_s1] sm:$0xf]  ;;  %v1497_v1 = vld [vmem:[%s2271_s1 + $0xc] sm:$0xf0] }
   0xc   :  { %v1309_v2 = vld [vmem:[%s2271_s1 + $0x8] sm:$0xf]  ;;  %v1302_v3 = vor.u32 %v1497_v1, %v1301_v0  ;;  %v1498_v4 = vld [vmem:[%s2271_s1 + $0x14] sm:$0xf0]  ;;  %v1496_v5 = vld [vmem:[%s2271_s1 + $0xc] sm:$0xf] }
   0xd   :  { %v1311_v6 = vld [vmem:[%s2271_s1 + $0x18] sm:$0xf0]  ;;  %v1310_v7 = vor.u32 %v1498_v4, %v1309_v2  ;;  %v1745_v9 = vld [vmem:[%s2270_s0] sm:$0xff]  ;;  %vm122_vm0 = vcmask 130048   ;;  %v1303_v12 = vld [vmem:[%s2271_s1 + $0x10] sm:$0xf0] }
   0xe   :  { %v1314_v8 = vor.u32 %v1496_v5, %v1311_v6  ;;  %v1750_v10 = vld [vmem:[%s2270_s0 + $0x18] sm:$0xff]  ;;  %v1495_v11 = vld [vmem:[%s2271_s1 + $0x4] sm:$0xf]  ;;  %142 = vmatpush.bf16.msra.mxu0 %v1302_v3  ;;  %1539 = vmatpush.bf16.msra.mxu1 %v1302_v3  ;;  %v1447_v15 = vld [vmem:[#allocation5 + $0xf0] sm:$0xf0]  ;;  %vm1275_vm1 = vcmask 31744  }
   0xf   :  { %v1527_v13 = vld [vmem:[#allocation5 + $0xe4] sm:$0xf]  ;;  %200 = vmatpush.bf16.msra.mxu2 %v1310_v7  ;;  %v1306_v14 = vor.u32 %v1495_v11, %v1303_v12  ;;  %v1453_v16 = vld [vmem:[#allocation5 + $0xe8] sm:$0xf]  ;;  %v1530_v17 = vld [vmem:[#allocation5 + $0xf4] sm:$0xf0] }
  0x10   :  { %229 = vmatpush.bf16.msra.mxu3 %v1314_v8  ;;  %v1758_v18 = vor.u32 %v1527_v13, %v1447_v15  ;;  %v1760_v19 = vor.u32 %v1530_v17, %v1453_v16  ;;  %v1445_v20 = vld [vmem:[#allocation5 + $0xe0] sm:$0xf]  ;;  %v1529_v21 = vld [vmem:[#allocation5 + $0xec] sm:$0xf0]  ;;  %v1528_v25 = vld [vmem:[#allocation5 + $0xec] sm:$0xf] }
  0x11   :  { %v1429_v22 = vld [vmem:[#allocation5 + $0xc0] sm:$0xf]  ;;  %1315 = vmatmul.msk.bf16.vlgmr.msra.gmra.mxu0 %vm122_vm0, %v1745_v9  ;;  %1318 = vmatmul.msk.bf16.vlgmr.msra.gmra.mxu1 %vm122_vm0, %v1750_v10  ;;  %v1766_v23 = vor.u32 %v1529_v21, %v1445_v20  ;;  %v1525_v24 = vld [vmem:[#allocation5 + $0xcc] sm:$0xf0]  ;;  %v1455_v26 = vld [vmem:[#allocation5 + $0xf8] sm:$0xf0] }
  0x12   :  { %171 = vmatpush.bf16.msrb.mxu1 %v1306_v14  ;;  %1323 = vmatmul.msk.bf16.vlgmr.msra.gmra.mxu2 %vm122_vm0, %v1745_v9  ;;  %v1770_v27 = vor.u32 %v1528_v25, %v1455_v26  ;;  %v1523_v28 = vld [vmem:[#allocation5 + $0xc4] sm:$0xf]  ;;  %v1431_v29 = vld [vmem:[#allocation5 + $0xd0] sm:$0xf0]  ;;  %v1437_v30 = vld [vmem:[#allocation5 + $0xc8] sm:$0xf]  ;;  %v1779_v33 = vor.u32 %v1525_v24, %v1429_v22 }
  0x13   :  { %1327 = vmatmul.msk.bf16.vlgmr.msra.gmra.mxu3 %vm122_vm0, %v1745_v9  ;;  %v1775_v31 = vor.u32 %v1523_v28, %v1431_v29  ;;  %v1526_v32 = vld [vmem:[#allocation5 + $0xd4] sm:$0xf0]  ;;  %511 = vmatpush.bf16.msrb.mxu2 %v1760_v19  ;;  %v1413_v35 = vld [vmem:[#allocation5 + $0xa0] sm:$0xf]  ;;  %v1524_v36 = vld [vmem:[#allocation5 + $0xcc] sm:$0xf] }
  0x14   :  { %485 = vmatpush.bf16.msrb.mxu0 %v1766_v23  ;;  %v1781_v34 = vor.u32 %v1526_v32, %v1437_v30  ;;  %524 = vmatpush.bf16.msrb.mxu3 %v1770_v27  ;;  %v1521_v37 = vld [vmem:[#allocation5 + $0xac] sm:$0xf0]  ;;  %v1439_v38 = vld [vmem:[#allocation5 + $0xd8] sm:$0xf0]  ;;  %v1519_v39 = vld [vmem:[#allocation5 + $0xa4] sm:$0xf] }
  0x15   :  { %v1784_v40 = vor.u32 %v1524_v36, %v1439_v38  ;;  %v1415_v41 = vld [vmem:[#allocation5 + $0xb0] sm:$0xf0]  ;;  %v1421_v42 = vld [vmem:[#allocation5 + $0xa8] sm:$0xf]  ;;  %v1522_v43 = vld [vmem:[#allocation5 + $0xb4] sm:$0xf0]  ;;  %v1791_v46 = vor.u32 %v1521_v37, %v1413_v35 }
  0x16   :  { %498 = vmatpush.bf16.msra.mxu1 %v1758_v18  ;;  %v1397_v44 = vld [vmem:[#allocation5 + $0x80] sm:$0xf]  ;;  %v1787_v45 = vor.u32 %v1519_v39, %v1415_v41  ;;  %v1517_v47 = vld [vmem:[#allocation5 + $0x8c] sm:$0xf0]  ;;  %v1793_v48 = vor.u32 %v1522_v43, %v1421_v42  ;;  %v1520_v49 = vld [vmem:[#allocation5 + $0xac] sm:$0xf] }
  0x17   :  { %512 = vmatpush.bf16.msrb.mxu2 %v1781_v34  ;;  %v1423_v50 = vld [vmem:[#allocation5 + $0xb8] sm:$0xf0]  ;;  %v1515_v52 = vld [vmem:[#allocation5 + $0x84] sm:$0xf]  ;;  %v1399_v53 = vld [vmem:[#allocation5 + $0x90] sm:$0xf0]  ;;  %v1802_v58 = vor.u32 %v1517_v47, %v1397_v44 }
  0x18   :  { %486 = vmatpush.bf16.msrb.mxu0 %v1779_v33  ;;  %525 = vmatpush.bf16.msrb.mxu3 %v1784_v40  ;;  %v1796_v51 = vor.u32 %v1520_v49, %v1423_v50  ;;  %v1405_v54 = vld [vmem:[#allocation5 + $0x88] sm:$0xf]  ;;  %v1518_v55 = vld [vmem:[#allocation5 + $0x94] sm:$0xf0]  ;;  %v1799_v56 = vor.u32 %v1515_v52, %v1399_v53  ;;  %v1516_v57 = vld [vmem:[#allocation5 + $0x8c] sm:$0xf] }
  0x19   :  { %v1805_v59 = vor.u32 %v1518_v55, %v1405_v54  ;;  %v1407_v60 = vld [vmem:[#allocation5 + $0x98] sm:$0xf0]  ;;  %v1810_v61 = vld [vmem:[%s2270_s0 + $0x8] sm:$0xff]  ;;  %v1381_v62 = vld [vmem:[#allocation5 + $0x60] sm:$0xf] }
  0x1a   :  { %499 = vmatpush.bf16.msra.mxu1 %v1775_v31  ;;  %v1513_v63 = vld [vmem:[#allocation5 + $0x6c] sm:$0xf0]  ;;  %v1813_v0 = vor.u32 %v1516_v57, %v1407_v60  ;;  %v1365_v2 = vld [vmem:[#allocation5 + $0x40] sm:$0xf]  ;;  %v1389_v4 = vld [vmem:[#allocation5 + $0x68] sm:$0xf] }
  0x1b   :  { %513 = vmatpush.bf16.msrb.mxu2 %v1793_v48  ;;  %v1817_v1 = vor.u32 %v1513_v63, %v1381_v62  ;;  %v1509_v3 = vld [vmem:[#allocation5 + $0x4c] sm:$0xf0]  ;;  %v1514_v5 = vld [vmem:[#allocation5 + $0x74] sm:$0xf0]  ;;  %v1512_v6 = vld [vmem:[#allocation5 + $0x6c] sm:$0xf] }
  0x1c   :  { %487 = vmatpush.bf16.msrb.mxu0 %v1791_v46  ;;  %526 = vmatpush.bf16.msrb.mxu3 %v1796_v51  ;;  %v1827_v7 = vor.u32 %v1514_v5, %v1389_v4  ;;  %v1391_v8 = vld [vmem:[#allocation5 + $0x78] sm:$0xf0]  ;;  %v1349_v11 = vld [vmem:[#allocation5 + $0x20] sm:$0xf]  ;;  %v1505_v12 = vld [vmem:[#allocation5 + $0x2c] sm:$0xf0]  ;;  %v1834_v16 = vor.u32 %v1509_v3, %v1365_v2 }
  0x1d   :  { %v1511_v13 = vld [vmem:[#allocation5 + $0x64] sm:$0xf]  ;;  %v1383_v14 = vld [vmem:[#allocation5 + $0x70] sm:$0xf0]  ;;  %v1831_v15 = vor.u32 %v1512_v6, %v1391_v8  ;;  %v1510_v20 = vld [vmem:[#allocation5 + $0x54] sm:$0xf0]  ;;  %v1848_v37 = vor.u32 %v1505_v12, %v1349_v11 }
  0x1e   :  { %500 = vmatpush.bf16.msra.mxu1 %v1787_v45  ;;  %v1836_v17 = vor.u32 %v1511_v13, %v1383_v14  ;;  %v1508_v21 = vld [vmem:[#allocation5 + $0x4c] sm:$0xf]  ;;  %v1375_v22 = vld [vmem:[#allocation5 + $0x58] sm:$0xf0]  ;;  %v1507_v25 = vld [vmem:[#allocation5 + $0x44] sm:$0xf] }
  0x1f   :  { %514 = vmatpush.bf16.msrb.mxu2 %v1805_v59  ;;  %v1367_v26 = vld [vmem:[#allocation5 + $0x50] sm:$0xf0]  ;;  %v1357_v28 = vld [vmem:[#allocation5 + $0x28] sm:$0xf]  ;;  %v1843_v29 = vor.u32 %v1508_v21, %v1375_v22  ;;  %v1506_v32 = vld [vmem:[#allocation5 + $0x34] sm:$0xf0] }
  0x20   :  { %488 = vmatpush.bf16.msrb.mxu0 %v1802_v58  ;;  %527 = vmatpush.bf16.msrb.mxu3 %v1813_v0  ;;  %v1845_v30 = vor.u32 %v1507_v25, %v1367_v26  ;;  %v1504_v35 = vld [vmem:[#allocation5 + $0x2c] sm:$0xf]  ;;  %v1359_v36 = vld [vmem:[#allocation5 + $0x38] sm:$0xf0]  ;;  %v1333_v38 = vld [vmem:[#allocation5] sm:$0xf]  ;;  %v1851_v39 = vor.u32 %v1506_v32, %v1357_v28 }
  0x21   :  { %1316 = vmatmul.msk.bf16.gmra.mxu0 %vm122_vm0, %v1810_v61  ;;  %1319 = vmatmul.msk.bf16.vlgmr.msrb.gmra.mxu1 %vm122_vm0, %v1745_v9  ;;  %v1373_v9 = vld [vmem:[#allocation5 + $0x48] sm:$0xf]  ;;  %v1501_v41 = vld [vmem:[#allocation5 + $0xc] sm:$0xf0]  ;;  %v1502_v43 = vld [vmem:[#allocation5 + $0x14] sm:$0xf0]  ;;  %v1855_v44 = vor.u32 %v1504_v35, %v1359_v36 }
  0x22   :  { %501 = vmatpush.bf16.msra.mxu1 %v1799_v56  ;;  %1324 = vmatmul.msk.bf16.gmra.mxu2 %vm122_vm0, %v1810_v61  ;;  %v1839_v24 = vor.u32 %v1510_v20, %v1373_v9  ;;  %v1341_v42 = vld [vmem:[#allocation5 + $0x8] sm:$0xf]  ;;  %v1500_v47 = vld [vmem:[#allocation5 + $0xc] sm:$0xf]  ;;  %v1343_v49 = vld [vmem:[#allocation5 + $0x18] sm:$0xf0]  ;;  %v1858_v50 = vor.u32 %v1501_v41, %v1333_v38 }
  0x23   :  { %1328 = vmatmul.msk.bf16.gmra.mxu3 %vm122_vm0, %v1810_v61  ;;  %515 = vmatpush.bf16.msrb.mxu2 %v1827_v7  ;;  %v1861_v52 = vor.u32 %v1502_v43, %v1341_v42  ;;  %v1493_v53 = vld [vmem:[%s2270_s0 + $0x10] sm:$0xff]  ;;  %v1867_v54 = vor.u32 %v1500_v47, %v1343_v49  ;;  %v1503_v55 = vld [vmem:[#allocation5 + $0x24] sm:$0xf] }
  0x24   :  { %489 = vmatpush.bf16.msrb.mxu0 %v1817_v1  ;;  %528 = vmatpush.bf16.msrb.mxu3 %v1831_v15  ;;  %v1351_v57 = vld [vmem:[#allocation5 + $0x30] sm:$0xf0]  ;;  %v1499_v62 = vld [vmem:[#allocation5 + $0x4] sm:$0xf] }
  0x25   :  { %v1876_v60 = vor.u32 %v1503_v55, %v1351_v57  ;;  %v1335_v63 = vld [vmem:[#allocation5 + $0x10] sm:$0xf0] }
  0x26   :  { %502 = vmatpush.bf16.msra.mxu1 %v1836_v17  ;;  %v1881_v2 = vor.u32 %v1499_v62, %v1335_v63 }
  0x27   :  { %516 = vmatpush.bf16.msrb.mxu2 %v1839_v24 }
  0x28   :  { %490 = vmatpush.bf16.msrb.mxu0 %v1834_v16  ;;  %529 = vmatpush.bf16.msrb.mxu3 %v1843_v29 }
  0x2a   :  { %503 = vmatpush.bf16.msra.mxu1 %v1845_v30 }
  0x2b   :  { %517 = vmatpush.bf16.msrb.mxu2 %v1851_v39 }
  0x2c   :  { %491 = vmatpush.bf16.msrb.mxu0 %v1848_v37  ;;  %530 = vmatpush.bf16.msrb.mxu3 %v1855_v44 }
  0x2e   :  { %504 = vmatpush.bf16.msra.mxu1 %v1876_v60 }
  0x2f   :  { %518 = vmatpush.bf16.msrb.mxu2 %v1861_v52 }
  0x30   :  { %492 = vmatpush.bf16.msrb.mxu0 %v1858_v50  ;;  %531 = vmatpush.bf16.msrb.mxu3 %v1867_v54 }
  0x31   :  { %1317 = vmatmul.msk.bf16.gmra.mxu0 %vm122_vm0, %v1493_v53  ;;  %1320 = vmatmul.msk.bf16.gmra.mxu1 %vm122_vm0, %v1810_v61  ;;  %v1682_v61 = vmov 0.0|0.0  }
  0x32   :  { %1325 = vmatmul.msk.bf16.gmra.mxu2 %vm122_vm0, %v1493_v53  ;;  %505 = vmatpush.bf16.msra.mxu1 %v1881_v2 }
  0x33   :  { %1329 = vmatmul.msk.bf16.gmra.mxu3 %vm122_vm0, %v1493_v53  ;;  %599 = vmatpush.bf16.msra.mxu2 %v1760_v19 }
  0x34   :  { %573 = vmatpush.bf16.msra.mxu0 %v1766_v23  ;;  %612 = vmatpush.bf16.msra.mxu3 %v1770_v27 }
  0x36   :  { %586 = vmatpush.bf16.msrb.mxu1 %v1758_v18 }
  0x37   :  { %600 = vmatpush.bf16.msra.mxu2 %v1781_v34 }
  0x38   :  { %574 = vmatpush.bf16.msra.mxu0 %v1779_v33  ;;  %613 = vmatpush.bf16.msra.mxu3 %v1784_v40 }
  0x3a   :  { %587 = vmatpush.bf16.msrb.mxu1 %v1775_v31 }
  0x3b   :  { %601 = vmatpush.bf16.msra.mxu2 %v1793_v48 }
  0x3c   :  { %575 = vmatpush.bf16.msra.mxu0 %v1791_v46  ;;  %614 = vmatpush.bf16.msra.mxu3 %v1796_v51 }
  0x3e   :  { %588 = vmatpush.bf16.msrb.mxu1 %v1787_v45 }
  0x3f   :  { %602 = vmatpush.bf16.msra.mxu2 %v1805_v59 }
  0x40   :  { %576 = vmatpush.bf16.msra.mxu0 %v1802_v58  ;;  %615 = vmatpush.bf16.msra.mxu3 %v1813_v0 }
  0x41   :  { %1321 = vmatmul.msk.bf16.gmra.mxu1 %vm122_vm0, %v1493_v53  ;;  %493 = vmatmul.bf16.vlgmr.msrb.gmra.mxu0 %v1682_v61 }
  0x42   :  { %1326 = vmatmul.msk.bf16.gmra.mxu2 %vm122_vm0, %v1750_v10  ;;  %589 = vmatpush.bf16.msrb.mxu1 %v1799_v56 }
  0x43   :  { %1330 = vmatmul.msk.bf16.gmra.mxu3 %vm122_vm0, %v1750_v10  ;;  %603 = vmatpush.bf16.msra.mxu2 %v1827_v7 }
  0x44   :  { %577 = vmatpush.bf16.msra.mxu0 %v1817_v1  ;;  %616 = vmatpush.bf16.msra.mxu3 %v1831_v15 }
  0x46   :  { %590 = vmatpush.bf16.msrb.mxu1 %v1836_v17 }
  0x47   :  { %604 = vmatpush.bf16.msra.mxu2 %v1839_v24 }
  0x48   :  { %578 = vmatpush.bf16.msra.mxu0 %v1834_v16  ;;  %617 = vmatpush.bf16.msra.mxu3 %v1843_v29 }
  0x4a   :  { %591 = vmatpush.bf16.msrb.mxu1 %v1845_v30 }
  0x4b   :  { %605 = vmatpush.bf16.msra.mxu2 %v1851_v39 }
  0x4c   :  { %579 = vmatpush.bf16.msra.mxu0 %v1848_v37  ;;  %618 = vmatpush.bf16.msra.mxu3 %v1855_v44 }
  0x4e   :  { %592 = vmatpush.bf16.msrb.mxu1 %v1876_v60 }
  0x4f   :  { %606 = vmatpush.bf16.msra.mxu2 %v1861_v52 }
  0x50   :  { %580 = vmatpush.bf16.msra.mxu0 %v1858_v50  ;;  %619 = vmatpush.bf16.msra.mxu3 %v1867_v54 }
  0x51   :  { %1322 = vmatmul.msk.bf16.gmra.mxu1 %vm122_vm0, %v1750_v10  ;;  %v72_v10 = vld [vmem:[#allocation7] sm:$0xf] }
  0x52   :  { %519 = vmatmul.bf16.vlgmr.msrb.gmra.mxu2 %v1682_v61  ;;  %593 = vmatpush.bf16.msrb.mxu1 %v1881_v2  ;;  %v1954_v3 = vperm.slane %v72_v10, 0  ;;  %v1959_v8 = vperm.slane %v72_v10, 2  ;;  %v1961_v11 = vperm.slane %v72_v10, 3  ;;  %v1975_v47 = vperm.slane %v72_v10, 1 }
  0x53   :  { %532 = vmatmul.bf16.vlgmr.msrb.gmra.mxu3 %v1682_v61  ;;  %688 = vmatpush.bf16.msrb.mxu2 %v1760_v19 }
  0x54   :  { %662 = vmatpush.bf16.msrb.mxu0 %v1766_v23  ;;  %701 = vmatpush.bf16.msrb.mxu3 %v1770_v27 }
  0x57   :  { %689 = vmatpush.bf16.msrb.mxu2 %v1781_v34 }
  0x58   :  { %663 = vmatpush.bf16.msrb.mxu0 %v1779_v33  ;;  %702 = vmatpush.bf16.msrb.mxu3 %v1784_v40 }
  0x5b   :  { %690 = vmatpush.bf16.msrb.mxu2 %v1793_v48 }
  0x5c   :  { %664 = vmatpush.bf16.msrb.mxu0 %v1791_v46  ;;  %703 = vmatpush.bf16.msrb.mxu3 %v1796_v51 }
  0x5f   :  { %691 = vmatpush.bf16.msrb.mxu2 %v1805_v59 }
  0x60   :  { %665 = vmatpush.bf16.msrb.mxu0 %v1802_v58  ;;  %704 = vmatpush.bf16.msrb.mxu3 %v1813_v0 }
  0x61   :  { %506 = vmatmul.bf16.vlgmr.msra.gmra.mxu1 %v1682_v61 }
  0x62   :  { %675 = vmatpush.bf16.msra.mxu1 %v1758_v18 }
  0x63   :  { %692 = vmatpush.bf16.msrb.mxu2 %v1827_v7 }
  0x64   :  { %666 = vmatpush.bf16.msrb.mxu0 %v1817_v1  ;;  %705 = vmatpush.bf16.msrb.mxu3 %v1831_v15 }
  0x66   :  { %676 = vmatpush.bf16.msra.mxu1 %v1775_v31 }
  0x67   :  { %693 = vmatpush.bf16.msrb.mxu2 %v1839_v24 }
  0x68   :  { %667 = vmatpush.bf16.msrb.mxu0 %v1834_v16  ;;  %706 = vmatpush.bf16.msrb.mxu3 %v1843_v29 }
  0x6a   :  { %677 = vmatpush.bf16.msra.mxu1 %v1787_v45 }
  0x6b   :  { %694 = vmatpush.bf16.msrb.mxu2 %v1851_v39 }
  0x6c   :  { %668 = vmatpush.bf16.msrb.mxu0 %v1848_v37  ;;  %707 = vmatpush.bf16.msrb.mxu3 %v1855_v44 }
  0x6e   :  { %678 = vmatpush.bf16.msra.mxu1 %v1799_v56 }
  0x6f   :  { %695 = vmatpush.bf16.msrb.mxu2 %v1861_v52 }
  0x70   :  { %669 = vmatpush.bf16.msrb.mxu0 %v1858_v50  ;;  %708 = vmatpush.bf16.msrb.mxu3 %v1867_v54 }
  0x72   :  { %679 = vmatpush.bf16.msra.mxu1 %v1836_v17 }
  0x76   :  { %680 = vmatpush.bf16.msra.mxu1 %v1845_v30 }
  0x7a   :  { %681 = vmatpush.bf16.msra.mxu1 %v1876_v60 }
  0x7e   :  { %682 = vmatpush.bf16.msra.mxu1 %v1881_v2 }
  0x8e   :  { %v144_v4 = vpop.f32.mrf.mxu0  ;;  %v159_v5 = vpop.f32.mrf.mxu1 }
  0x8f   :  { %v1957_v6 = vadd.f32 %v159_v5, %v1954_v3 }
  0x95   :  { %v202_v12 = vpop.f32.mrf.mxu2 }
  0x96   :  { %v203_v13 = vadd.f32 %v202_v12, %v1959_v8  ;;  %v231_v14 = vpop.f32.mrf.mxu3  ;;  %v146_v9 = vpop.f32.mrf.mxu0 }
  0x97   :  { %v232_v20 = vadd.f32 %v231_v14, %v1961_v11  ;;  %v147_v21 = vadd.f32 %v146_v9, %v1954_v3  ;;  %v1966_v22 = vpop.f32.mrf.mxu1 }
  0x99   :  { %v1968_v25 = vpack.c.bf16 %v232_v20, %v203_v13 }
  0x9d   :  { %v204_v26 = vpop.f32.mrf.mxu2 }
  0x9e   :  { %v205_v28 = vadd.f32 %v204_v26, %v1959_v8  ;;  %v233_v32 = vpop.f32.mrf.mxu3  ;;  %v149_v35 = vpop.f32.mrf.mxu0 }
  0x9f   :  { %v234_v36 = vadd.f32 %v233_v32, %v1961_v11  ;;  %v150_v38 = vadd.f32 %v149_v35, %v1954_v3  ;;  %v173_v41 = vpop.f32.mrf.mxu1 }
  0xa1   :  { %v1973_v42 = vpack.c.bf16 %v234_v36, %v205_v28 }
  0xa5   :  { %v207_v43 = vpop.f32.mrf.mxu2 }
  0xa6   :  { %v208_v49 = vadd.f32 %v207_v43, %v1959_v8  ;;  %v236_v53 = vpop.f32.mrf.mxu3  ;;  %v151_v55 = vpop.f32.mrf.mxu0 }
  0xa7   :  { %v237_v57 = vadd.f32 %v236_v53, %v1961_v11  ;;  %v152_v62 = vadd.f32 %v151_v55, %v1954_v3  ;;  %v175_v63 = vpop.f32.mrf.mxu1 }
  0xa8   :  { %v176_v61 = vadd.f32 %v175_v63, %v1975_v47 }
  0xa9   :  { %v1981_v5 = vpack.c.bf16 %v237_v57, %v208_v49 }
  0xaa   :  { %v1983_v12 = vpack.c.bf16 %v176_v61, %v147_v21 }
  0xab   :  { %2282 = vst [vmem:[#allocation11_spill] sm:$0xff] %v1981_v5 }
  0xad   :  { %v209_v13 = vpop.f32.mrf.mxu2 }
  0xae   :  { %v210_v14 = vadd.f32 %v209_v13, %v1959_v8  ;;  %v238_v10 = vpop.f32.mrf.mxu3  ;;  %v154_v9 = vpop.f32.mrf.mxu0 }
  0xaf   :  { %v239_v20 = vadd.f32 %v238_v10, %v1961_v11  ;;  %v155_v26 = vadd.f32 %v154_v9, %v1954_v3  ;;  %v178_v28 = vpop.f32.mrf.mxu1  ;;  %v174_v9 = vadd.f32 %v173_v41, %v1975_v47 }
  0xb0   :  { %v179_v32 = vadd.f32 %v178_v28, %v1975_v47 }
  0xb1   :  { %v1989_v35 = vpack.c.bf16 %v239_v20, %v210_v14 }
  0xb2   :  { %v1991_v36 = vpack.c.bf16 %v179_v32, %v150_v38  ;;  %v145_v38 = vadd.f32 %v144_v4, %v1954_v3 }
  0xb3   :  { %2283 = vst [vmem:[#allocation12_spill] sm:$0xff] %v1989_v35 }
  0xb5   :  { %v212_v43 = vpop.f32.mrf.mxu2 }
  0xb6   :  { %v213_v21 = vadd.f32 %v212_v43, %v1959_v8  ;;  %v241_v49 = vpop.f32.mrf.mxu3  ;;  %v156_v53 = vpop.f32.mrf.mxu0 }
  0xb7   :  { %v242_v55 = vadd.f32 %v241_v49, %v1961_v11  ;;  %v157_v57 = vadd.f32 %v156_v53, %v1954_v3  ;;  %v180_v63 = vpop.f32.mrf.mxu1 }
  0xb8   :  { %v181_v61 = vadd.f32 %v180_v63, %v1975_v47 }
  0xb9   :  { %v1997_v13 = vpack.c.bf16 %v242_v55, %v213_v21  ;;  %v251_v21 = vpack.c.bf16 %v174_v9, %v145_v38 }
  0xba   :  { %v1999_v10 = vpack.c.bf16 %v181_v61, %v152_v62 }
  0xbb   :  { %2284 = vst [vmem:[#allocation13_spill] sm:$0xff] %v1997_v13  ;;  %v288_v63 = vunpack.c.l.bf16 %v251_v21 }
  0xbc   :  { %2285 = vst [vmem:[#allocation14_spill] sm:$0xff] %v1999_v10 }
  0xbd   :  { %v214_v14 = vpop.f32.mrf.mxu2 }
  0xbe   :  { %v215_v20 = vadd.f32 %v214_v14, %v1959_v8  ;;  %v243_v28 = vpop.f32.mrf.mxu3  ;;  %v494_v32 = vpop.f32.mrf.mxu0 }
  0xbf   :  { %v244_v43 = vadd.f32 %v243_v28, %v1961_v11  ;;  %v183_v49 = vpop.f32.mrf.mxu1  ;;  %v537_v10 = vadd.f32 %v494_v32, %v288_v63 }
  0xc0   :  { %v184_v53 = vadd.f32 %v183_v49, %v1975_v47 }
  0xc1   :  { %v2006_v35 = vpack.c.bf16 %v244_v43, %v215_v20  ;;  %v541_v20 = vmul.f32 0.5, %v537_v10 }
  0xc2   :  { %v2008_v55 = vpack.c.bf16 %v184_v53, %v155_v26 }
  0xc3   :  { %1546 = vtanh.f32 %v541_v20 }
  0xc5   :  { %v217_v62 = vpop.f32.mrf.mxu2 }
  0xc6   :  { %v218_v4 = vadd.f32 %v217_v62, %v1959_v8  ;;  %v246_v61 = vpop.f32.mrf.mxu3  ;;  %v496_v41 = vpop.f32.mrf.mxu0 }
  0xc7   :  { %v247_v14 = vadd.f32 %v246_v61, %v1961_v11  ;;  %v185_v13 = vpop.f32.mrf.mxu1 }
  0xc8   :  { %v186_v28 = vadd.f32 %v185_v13, %v1975_v47  ;;  %v290_v13 = vunpack.c.l.bf16 %v1968_v25 }
  0xc9   :  { %v2013_v5 = vpack.c.bf16 %v247_v14, %v218_v4  ;;  %v1547_v63 = vpop.eup %1546 }
  0xca   :  { %v2015_v49 = vpack.c.bf16 %v186_v28, %v157_v57  ;;  %v543_v14 = vmul.f32 0.5, %v1547_v63 }
  0xcc   :  { %v544_v20 = vadd.f32 0.5, %v543_v14 }
  0xcd   :  { %v219_v38 = vpop.f32.mrf.mxu2 }
  0xce   :  { %v220_v26 = vadd.f32 %v219_v38, %v1959_v8  ;;  %v248_v9 = vpop.f32.mrf.mxu3  ;;  %v162_v8 = vadd.f32 %v1966_v22, %v1954_v3 }
  0xcf   :  { %v249_v43 = vadd.f32 %v248_v9, %v1961_v11  ;;  %v188_v53 = vpop.f32.mrf.mxu1 }
  0xd0   :  { %v189_v62 = vadd.f32 %v188_v53, %v1975_v47 }
  0xd1   :  { %v2020_v61 = vpack.c.bf16 %v249_v43, %v220_v26  ;;  %v289_v26 = vunpack.c.h.bf16 %v251_v21 }
  0xd2   :  { %v2023_v32 = vpack.c.bf16 %v189_v62, %v1957_v6 }
  0xd3   :  { %2286 = vst [vmem:[#allocation15_spill] sm:$0xff] %v2020_v61 }
  0xd5   :  { %v520_v57 = vpop.f32.mrf.mxu2 }
  0xd6   :  { %v539_v10 = vadd.f32 %v520_v57, %v290_v13  ;;  %v533_v4 = vpop.f32.mrf.mxu3  ;;  %v291_v13 = vunpack.c.h.bf16 %v1968_v25 }
  0xd7   :  { %v190_v41 = vpop.f32.mrf.mxu1 }
  0xd8   :  { %1548 = vtanh.f32 %v539_v10  ;;  %v191_v11 = vadd.f32 %v190_v41, %v1975_v47  ;;  %v540_v61 = vadd.f32 %v533_v4, %v291_v13  ;;  %v569_v4 = vunpack.c.h.bf16 %v1983_v12 }
  0xd9   :  { %v570_v13 = vunpack.c.l.bf16 %v1973_v42 }
  0xda   :  { %v2029_v28 = vpack.c.bf16 %v191_v11, %v162_v8  ;;  %v550_v3 = vmul.f32 0.5, %v540_v61  ;;  %v568_v61 = vunpack.c.l.bf16 %v1983_v12 }
  0xdd   :  { %v522_v38 = vpop.f32.mrf.mxu2 }
  0xde   :  { %v1549_v6 = vpop.eup %1548  ;;  %v535_v9 = vpop.f32.mrf.mxu3 }
  0xdf   :  { %v555_v43 = vmul.f32 %v1549_v6, %v544_v20  ;;  %v507_v53 = vpop.f32.mrf.mxu1 }
  0xe0   :  { %v538_v62 = vadd.f32 %v507_v53, %v289_v26 }
  0xe2   :  { %v545_v57 = vmul.f32 0.5, %v538_v62 }
  0xe4   :  { %1550 = vtanh.f32 %v545_v57  ;;  %v571_v57 = vunpack.c.h.bf16 %v1973_v42 }
  0xe5   :  { %1552 = vtanh.f32 %v550_v3 }
  0xe7   :  { %v509_v22 = vpop.f32.mrf.mxu1 }
  0xea   :  { %v1551_v10 = vpop.eup %1550 }
  0xeb   :  { %v547_v47 = vmul.f32 0.5, %v1551_v10  ;;  %v1553_v8 = vpop.eup %1552 }
  0xec   :  { %v552_v21 = vmul.f32 0.5, %v1553_v8 }
  0xed   :  { %v548_v63 = vadd.f32 0.5, %v547_v47 }
  0xee   :  { %v553_v14 = vadd.f32 0.5, %v552_v21 }
  0xef   :  { %v554_v41 = vmul.f32 0.0, %v548_v63 }
  0xf1   :  { %v2032_v11 = vadd.f32 %v555_v43, %v554_v41 }
  0xf3   :  { %1554 = vtanh.f32 %v2032_v11 }
  0xf9   :  { %v1555_v20 = vpop.eup %1554 }
  0xfa   :  { %v558_v38 = vmul.f32 %v1555_v20, %v553_v14 }
  0xfc   :  { %v572_v25 = vpack.c.bf16 %v558_v38, %v558_v38 }
  0xfe   :  { %581 = vmatmul.bf16.vlgmr.msra.gmra.mxu0 %v572_v25  ;;  %594 = vmatmul.bf16.vlgmr.msrb.gmra.mxu1 %v572_v25 }
  0xff   :  { %607 = vmatmul.bf16.vlgmr.msra.gmra.mxu2 %v572_v25  ;;  %620 = vmatmul.bf16.vlgmr.msra.gmra.mxu3 %v572_v25 }
 0x100   :  { %751 = vmatpush.bf16.msra.mxu0 %v1766_v23  ;;  %764 = vmatpush.bf16.msrb.mxu1 %v1758_v18 }
 0x101   :  { %777 = vmatpush.bf16.msra.mxu2 %v1760_v19  ;;  %790 = vmatpush.bf16.msra.mxu3 %v1770_v27 }
 0x104   :  { %752 = vmatpush.bf16.msra.mxu0 %v1779_v33  ;;  %765 = vmatpush.bf16.msrb.mxu1 %v1775_v31 }
 0x105   :  { %778 = vmatpush.bf16.msra.mxu2 %v1781_v34  ;;  %791 = vmatpush.bf16.msra.mxu3 %v1784_v40 }
 0x108   :  { %753 = vmatpush.bf16.msra.mxu0 %v1791_v46  ;;  %766 = vmatpush.bf16.msrb.mxu1 %v1787_v45 }
 0x109   :  { %779 = vmatpush.bf16.msra.mxu2 %v1793_v48  ;;  %792 = vmatpush.bf16.msra.mxu3 %v1796_v51 }
 0x10c   :  { %754 = vmatpush.bf16.msra.mxu0 %v1802_v58  ;;  %767 = vmatpush.bf16.msrb.mxu1 %v1799_v56 }
 0x10d   :  { %780 = vmatpush.bf16.msra.mxu2 %v1805_v59  ;;  %793 = vmatpush.bf16.msra.mxu3 %v1813_v0 }
 0x110   :  { %755 = vmatpush.bf16.msra.mxu0 %v1817_v1  ;;  %768 = vmatpush.bf16.msrb.mxu1 %v1836_v17 }
 0x111   :  { %781 = vmatpush.bf16.msra.mxu2 %v1827_v7  ;;  %794 = vmatpush.bf16.msra.mxu3 %v1831_v15 }
 0x114   :  { %756 = vmatpush.bf16.msra.mxu0 %v1834_v16  ;;  %769 = vmatpush.bf16.msrb.mxu1 %v1845_v30 }
 0x115   :  { %782 = vmatpush.bf16.msra.mxu2 %v1839_v24  ;;  %795 = vmatpush.bf16.msra.mxu3 %v1843_v29 }
 0x118   :  { %757 = vmatpush.bf16.msra.mxu0 %v1848_v37  ;;  %770 = vmatpush.bf16.msrb.mxu1 %v1876_v60 }
 0x119   :  { %783 = vmatpush.bf16.msra.mxu2 %v1851_v39  ;;  %796 = vmatpush.bf16.msra.mxu3 %v1855_v44 }
 0x11c   :  { %758 = vmatpush.bf16.msra.mxu0 %v1858_v50  ;;  %771 = vmatpush.bf16.msrb.mxu1 %v1881_v2 }
 0x11d   :  { %784 = vmatpush.bf16.msra.mxu2 %v1861_v52  ;;  %797 = vmatpush.bf16.msra.mxu3 %v1867_v54 }
 0x17b   :  { %v582_v6 = vpop.f32.mrf.mxu0  ;;  %v595_v26 = vpop.f32.mrf.mxu1 }
 0x17c   :  { %v625_v9 = vadd.f32 %v582_v6, %v568_v61  ;;  %v626_v43 = vadd.f32 %v595_v26, %v569_v4 }
 0x17e   :  { %v629_v53 = vmul.f32 0.5, %v625_v9  ;;  %v633_v62 = vmul.f32 0.5, %v626_v43 }
 0x180   :  { %1556 = vtanh.f32 %v629_v53 }
 0x181   :  { %1558 = vtanh.f32 %v633_v62 }
 0x182   :  { %v608_v3 = vpop.f32.mrf.mxu2  ;;  %v621_v22 = vpop.f32.mrf.mxu3 }
 0x183   :  { %v627_v10 = vadd.f32 %v608_v3, %v570_v13  ;;  %v628_v47 = vadd.f32 %v621_v22, %v571_v57  ;;  %v584_v63 = vpop.f32.mrf.mxu0  ;;  %v597_v41 = vpop.f32.mrf.mxu1  ;;  %v658_v22 = vunpack.c.h.bf16 %v1991_v36 }
 0x185   :  { %1560 = vtanh.f32 %v627_v10  ;;  %v638_v12 = vmul.f32 0.5, %v628_v47 }
 0x186   :  { %v1557_v8 = vpop.eup %1556 }
 0x187   :  { %v1559_v21 = vpop.eup %1558  ;;  %v631_v14 = vmul.f32 0.5, %v1557_v8  ;;  %1562 = vtanh.f32 %v638_v12 }
 0x188   :  { %v635_v20 = vmul.f32 0.5, %v1559_v21  ;;  %v2287_v21 = vld [vmem:[#allocation11_spill] sm:$0xff] }
 0x189   :  { %v632_v38 = vadd.f32 0.5, %v631_v14  ;;  %v659_v14 = vunpack.c.l.bf16 %v2287_v21 }
 0x18a   :  { %v636_v25 = vadd.f32 0.5, %v635_v20  ;;  %v610_v61 = vpop.f32.mrf.mxu2  ;;  %v623_v4 = vpop.f32.mrf.mxu3  ;;  %v660_v20 = vunpack.c.h.bf16 %v2287_v21 }
 0x18b   :  { %v1561_v6 = vpop.eup %1560 }
 0x18c   :  { %v642_v42 = vmul.f32 %v636_v25, %v2032_v11  ;;  %v643_v26 = vmul.f32 %v1561_v6, %v632_v38  ;;  %v657_v11 = vunpack.c.l.bf16 %v1991_v36 }
 0x18d   :  { %v1563_v9 = vpop.eup %1562 }
 0x18e   :  { %v2072_v43 = vadd.f32 %v643_v26, %v642_v42  ;;  %v640_v53 = vmul.f32 0.5, %v1563_v9 }
 0x190   :  { %1564 = vtanh.f32 %v2072_v43  ;;  %v641_v62 = vadd.f32 0.5, %v640_v53 }
 0x196   :  { %v1565_v13 = vpop.eup %1564 }
 0x197   :  { %v646_v57 = vmul.f32 %v1565_v13, %v641_v62 }
 0x199   :  { %v661_v3 = vpack.c.bf16 %v646_v57, %v646_v57 }
 0x19b   :  { %670 = vmatmul.bf16.vlgmr.msrb.gmra.mxu0 %v661_v3  ;;  %683 = vmatmul.bf16.vlgmr.msra.gmra.mxu1 %v661_v3 }
 0x19c   :  { %696 = vmatmul.bf16.vlgmr.msrb.gmra.mxu2 %v661_v3  ;;  %709 = vmatmul.bf16.vlgmr.msrb.gmra.mxu3 %v661_v3 }
 0x19d   :  { %840 = vmatpush.bf16.msrb.mxu0 %v1766_v23  ;;  %853 = vmatpush.bf16.msra.mxu1 %v1758_v18 }
 0x19e   :  { %866 = vmatpush.bf16.msrb.mxu2 %v1760_v19  ;;  %879 = vmatpush.bf16.msrb.mxu3 %v1770_v27 }
 0x1a1   :  { %841 = vmatpush.bf16.msrb.mxu0 %v1779_v33  ;;  %854 = vmatpush.bf16.msra.mxu1 %v1775_v31 }
 0x1a2   :  { %867 = vmatpush.bf16.msrb.mxu2 %v1781_v34  ;;  %880 = vmatpush.bf16.msrb.mxu3 %v1784_v40 }
 0x1a5   :  { %842 = vmatpush.bf16.msrb.mxu0 %v1791_v46  ;;  %855 = vmatpush.bf16.msra.mxu1 %v1787_v45 }
 0x1a6   :  { %868 = vmatpush.bf16.msrb.mxu2 %v1793_v48  ;;  %881 = vmatpush.bf16.msrb.mxu3 %v1796_v51 }
 0x1a9   :  { %843 = vmatpush.bf16.msrb.mxu0 %v1802_v58  ;;  %856 = vmatpush.bf16.msra.mxu1 %v1799_v56 }
 0x1aa   :  { %869 = vmatpush.bf16.msrb.mxu2 %v1805_v59  ;;  %882 = vmatpush.bf16.msrb.mxu3 %v1813_v0 }
 0x1ad   :  { %844 = vmatpush.bf16.msrb.mxu0 %v1817_v1  ;;  %857 = vmatpush.bf16.msra.mxu1 %v1836_v17 }
 0x1ae   :  { %870 = vmatpush.bf16.msrb.mxu2 %v1827_v7  ;;  %883 = vmatpush.bf16.msrb.mxu3 %v1831_v15 }
 0x1b1   :  { %845 = vmatpush.bf16.msrb.mxu0 %v1834_v16  ;;  %858 = vmatpush.bf16.msra.mxu1 %v1845_v30 }
 0x1b2   :  { %871 = vmatpush.bf16.msrb.mxu2 %v1839_v24  ;;  %884 = vmatpush.bf16.msrb.mxu3 %v1843_v29 }
 0x1b5   :  { %846 = vmatpush.bf16.msrb.mxu0 %v1848_v37  ;;  %859 = vmatpush.bf16.msra.mxu1 %v1876_v60 }
 0x1b6   :  { %872 = vmatpush.bf16.msrb.mxu2 %v1851_v39  ;;  %885 = vmatpush.bf16.msrb.mxu3 %v1855_v44 }
 0x1b9   :  { %847 = vmatpush.bf16.msrb.mxu0 %v1858_v50  ;;  %860 = vmatpush.bf16.msra.mxu1 %v1881_v2 }
 0x1ba   :  { %873 = vmatpush.bf16.msrb.mxu2 %v1861_v52  ;;  %886 = vmatpush.bf16.msrb.mxu3 %v1867_v54 }
 0x218   :  { %v671_v10 = vpop.f32.mrf.mxu0  ;;  %v684_v47 = vpop.f32.mrf.mxu1 }
 0x219   :  { %v714_v63 = vadd.f32 %v671_v10, %v657_v11  ;;  %v715_v41 = vadd.f32 %v684_v47, %v658_v22 }
 0x21b   :  { %v718_v12 = vmul.f32 0.5, %v714_v63  ;;  %v722_v8 = vmul.f32 0.5, %v715_v41 }
 0x21d   :  { %1566 = vtanh.f32 %v718_v12 }
 0x21e   :  { %1568 = vtanh.f32 %v722_v8 }
 0x21f   :  { %v697_v38 = vpop.f32.mrf.mxu2  ;;  %v710_v25 = vpop.f32.mrf.mxu3 }
 0x220   :  { %v716_v61 = vadd.f32 %v697_v38, %v659_v14  ;;  %v717_v4 = vadd.f32 %v710_v25, %v660_v20  ;;  %v673_v6 = vpop.f32.mrf.mxu0  ;;  %v686_v42 = vpop.f32.mrf.mxu1 }
 0x222   :  { %1570 = vtanh.f32 %v716_v61  ;;  %v727_v36 = vmul.f32 0.5, %v717_v4 }
 0x223   :  { %v1567_v26 = vpop.eup %1566 }
 0x224   :  { %v1569_v9 = vpop.eup %1568  ;;  %v720_v53 = vmul.f32 0.5, %v1567_v26  ;;  %1572 = vtanh.f32 %v727_v36 }
 0x225   :  { %v724_v62 = vmul.f32 0.5, %v1569_v9  ;;  %v2289_v9 = vld [vmem:[#allocation12_spill] sm:$0xff] }
 0x226   :  { %v721_v13 = vadd.f32 0.5, %v720_v53  ;;  %v748_v53 = vunpack.c.l.bf16 %v2289_v9 }
 0x227   :  { %v725_v57 = vadd.f32 0.5, %v724_v62  ;;  %v699_v3 = vpop.f32.mrf.mxu2  ;;  %v712_v11 = vpop.f32.mrf.mxu3  ;;  %v749_v62 = vunpack.c.h.bf16 %v2289_v9 }
 0x228   :  { %v1571_v22 = vpop.eup %1570 }
 0x229   :  { %v731_v10 = vmul.f32 %v725_v57, %v2072_v43  ;;  %v732_v47 = vmul.f32 %v1571_v22, %v721_v13  ;;  %v2288_v43 = vld [vmem:[#allocation14_spill] sm:$0xff] }
 0x22a   :  { %v1573_v63 = vpop.eup %1572  ;;  %v746_v38 = vunpack.c.l.bf16 %v2288_v43  ;;  %v747_v25 = vunpack.c.h.bf16 %v2288_v43 }
 0x22b   :  { %v2112_v41 = vadd.f32 %v732_v47, %v731_v10  ;;  %v729_v12 = vmul.f32 0.5, %v1573_v63 }
 0x22d   :  { %1574 = vtanh.f32 %v2112_v41  ;;  %v730_v8 = vadd.f32 0.5, %v729_v12 }
 0x233   :  { %v1575_v21 = vpop.eup %1574 }
 0x234   :  { %v735_v14 = vmul.f32 %v1575_v21, %v730_v8 }
 0x236   :  { %v750_v20 = vpack.c.bf16 %v735_v14, %v735_v14 }
 0x238   :  { %759 = vmatmul.bf16.vlgmr.msra.gmra.mxu0 %v750_v20  ;;  %772 = vmatmul.bf16.vlgmr.msrb.gmra.mxu1 %v750_v20 }
 0x239   :  { %785 = vmatmul.bf16.vlgmr.msra.gmra.mxu2 %v750_v20  ;;  %798 = vmatmul.bf16.vlgmr.msra.gmra.mxu3 %v750_v20 }
 0x23a   :  { %929 = vmatpush.bf16.msra.mxu0 %v1766_v23  ;;  %942 = vmatpush.bf16.msrb.mxu1 %v1758_v18 }
 0x23b   :  { %955 = vmatpush.bf16.msra.mxu2 %v1760_v19  ;;  %968 = vmatpush.bf16.msra.mxu3 %v1770_v27 }
 0x23e   :  { %930 = vmatpush.bf16.msra.mxu0 %v1779_v33  ;;  %943 = vmatpush.bf16.msrb.mxu1 %v1775_v31 }
 0x23f   :  { %956 = vmatpush.bf16.msra.mxu2 %v1781_v34  ;;  %969 = vmatpush.bf16.msra.mxu3 %v1784_v40 }
 0x242   :  { %931 = vmatpush.bf16.msra.mxu0 %v1791_v46  ;;  %944 = vmatpush.bf16.msrb.mxu1 %v1787_v45 }
 0x243   :  { %957 = vmatpush.bf16.msra.mxu2 %v1793_v48  ;;  %970 = vmatpush.bf16.msra.mxu3 %v1796_v51 }
 0x246   :  { %932 = vmatpush.bf16.msra.mxu0 %v1802_v58  ;;  %945 = vmatpush.bf16.msrb.mxu1 %v1799_v56 }
 0x247   :  { %958 = vmatpush.bf16.msra.mxu2 %v1805_v59  ;;  %971 = vmatpush.bf16.msra.mxu3 %v1813_v0 }
 0x24a   :  { %933 = vmatpush.bf16.msra.mxu0 %v1817_v1  ;;  %946 = vmatpush.bf16.msrb.mxu1 %v1836_v17 }
 0x24b   :  { %959 = vmatpush.bf16.msra.mxu2 %v1827_v7  ;;  %972 = vmatpush.bf16.msra.mxu3 %v1831_v15 }
 0x24e   :  { %934 = vmatpush.bf16.msra.mxu0 %v1834_v16  ;;  %947 = vmatpush.bf16.msrb.mxu1 %v1845_v30 }
 0x24f   :  { %960 = vmatpush.bf16.msra.mxu2 %v1839_v24  ;;  %973 = vmatpush.bf16.msra.mxu3 %v1843_v29 }
 0x252   :  { %935 = vmatpush.bf16.msra.mxu0 %v1848_v37  ;;  %948 = vmatpush.bf16.msrb.mxu1 %v1876_v60 }
 0x253   :  { %961 = vmatpush.bf16.msra.mxu2 %v1851_v39  ;;  %974 = vmatpush.bf16.msra.mxu3 %v1855_v44 }
 0x256   :  { %936 = vmatpush.bf16.msra.mxu0 %v1858_v50  ;;  %949 = vmatpush.bf16.msrb.mxu1 %v1881_v2 }
 0x257   :  { %962 = vmatpush.bf16.msra.mxu2 %v1861_v52  ;;  %975 = vmatpush.bf16.msra.mxu3 %v1867_v54 }
 0x2b5   :  { %v760_v61 = vpop.f32.mrf.mxu0  ;;  %v773_v4 = vpop.f32.mrf.mxu1 }
 0x2b6   :  { %v803_v6 = vadd.f32 %v760_v61, %v746_v38  ;;  %v804_v42 = vadd.f32 %v773_v4, %v747_v25 }
 0x2b8   :  { %v807_v36 = vmul.f32 0.5, %v803_v6  ;;  %v811_v26 = vmul.f32 0.5, %v804_v42 }
 0x2ba   :  { %1576 = vtanh.f32 %v807_v36 }
 0x2bb   :  { %1578 = vtanh.f32 %v811_v26 }
 0x2bc   :  { %v786_v13 = vpop.f32.mrf.mxu2  ;;  %v799_v57 = vpop.f32.mrf.mxu3 }
 0x2bd   :  { %v805_v3 = vadd.f32 %v786_v13, %v748_v53  ;;  %v806_v11 = vadd.f32 %v799_v57, %v749_v62  ;;  %v762_v22 = vpop.f32.mrf.mxu0  ;;  %v775_v10 = vpop.f32.mrf.mxu1  ;;  %v836_v13 = vunpack.c.h.bf16 %v2008_v55 }
 0x2bf   :  { %1580 = vtanh.f32 %v805_v3  ;;  %v816_v47 = vmul.f32 0.5, %v806_v11 }
 0x2c0   :  { %v1577_v63 = vpop.eup %1576 }
 0x2c1   :  { %v1579_v12 = vpop.eup %1578  ;;  %v809_v8 = vmul.f32 0.5, %v1577_v63  ;;  %1582 = vtanh.f32 %v816_v47  ;;  %v2290_v63 = vld [vmem:[#allocation13_spill] sm:$0xff] }
 0x2c2   :  { %v813_v21 = vmul.f32 0.5, %v1579_v12  ;;  %v837_v12 = vunpack.c.l.bf16 %v2290_v63 }
 0x2c3   :  { %v810_v14 = vadd.f32 0.5, %v809_v8  ;;  %v838_v8 = vunpack.c.h.bf16 %v2290_v63 }
 0x2c4   :  { %v814_v20 = vadd.f32 0.5, %v813_v21  ;;  %v788_v43 = vpop.f32.mrf.mxu2  ;;  %v801_v38 = vpop.f32.mrf.mxu3 }
 0x2c5   :  { %v1581_v25 = vpop.eup %1580 }
 0x2c6   :  { %v820_v61 = vmul.f32 %v814_v20, %v2112_v41  ;;  %v821_v4 = vmul.f32 %v1581_v25, %v810_v14  ;;  %v835_v41 = vunpack.c.l.bf16 %v2008_v55 }
 0x2c7   :  { %v1583_v6 = vpop.eup %1582 }
 0x2c8   :  { %v2152_v42 = vadd.f32 %v821_v4, %v820_v61  ;;  %v818_v36 = vmul.f32 0.5, %v1583_v6 }
 0x2ca   :  { %1584 = vtanh.f32 %v2152_v42  ;;  %v819_v26 = vadd.f32 0.5, %v818_v36 }
 0x2d0   :  { %v1585_v9 = vpop.eup %1584 }
 0x2d1   :  { %v824_v53 = vmul.f32 %v1585_v9, %v819_v26 }
 0x2d3   :  { %v839_v62 = vpack.c.bf16 %v824_v53, %v824_v53 }
 0x2d5   :  { %848 = vmatmul.bf16.vlgmr.msrb.gmra.mxu0 %v839_v62  ;;  %861 = vmatmul.bf16.vlgmr.msra.gmra.mxu1 %v839_v62 }
 0x2d6   :  { %874 = vmatmul.bf16.vlgmr.msrb.gmra.mxu2 %v839_v62  ;;  %887 = vmatmul.bf16.vlgmr.msrb.gmra.mxu3 %v839_v62 }
 0x2d7   :  { %1018 = vmatpush.bf16.msrb.mxu0 %v1766_v23  ;;  %1031 = vmatpush.bf16.msra.mxu1 %v1758_v18 }
 0x2d8   :  { %1044 = vmatpush.bf16.msrb.mxu2 %v1760_v19  ;;  %1057 = vmatpush.bf16.msrb.mxu3 %v1770_v27 }
 0x2db   :  { %1019 = vmatpush.bf16.msrb.mxu0 %v1779_v33  ;;  %1032 = vmatpush.bf16.msra.mxu1 %v1775_v31 }
 0x2dc   :  { %1045 = vmatpush.bf16.msrb.mxu2 %v1781_v34  ;;  %1058 = vmatpush.bf16.msrb.mxu3 %v1784_v40 }
 0x2df   :  { %1020 = vmatpush.bf16.msrb.mxu0 %v1791_v46  ;;  %1033 = vmatpush.bf16.msra.mxu1 %v1787_v45 }
 0x2e0   :  { %1046 = vmatpush.bf16.msrb.mxu2 %v1793_v48  ;;  %1059 = vmatpush.bf16.msrb.mxu3 %v1796_v51 }
 0x2e3   :  { %1021 = vmatpush.bf16.msrb.mxu0 %v1802_v58  ;;  %1034 = vmatpush.bf16.msra.mxu1 %v1799_v56 }
 0x2e4   :  { %1047 = vmatpush.bf16.msrb.mxu2 %v1805_v59  ;;  %1060 = vmatpush.bf16.msrb.mxu3 %v1813_v0 }
 0x2e7   :  { %1022 = vmatpush.bf16.msrb.mxu0 %v1817_v1  ;;  %1035 = vmatpush.bf16.msra.mxu1 %v1836_v17 }
 0x2e8   :  { %1048 = vmatpush.bf16.msrb.mxu2 %v1827_v7  ;;  %1061 = vmatpush.bf16.msrb.mxu3 %v1831_v15 }
 0x2eb   :  { %1023 = vmatpush.bf16.msrb.mxu0 %v1834_v16  ;;  %1036 = vmatpush.bf16.msra.mxu1 %v1845_v30 }
 0x2ec   :  { %1049 = vmatpush.bf16.msrb.mxu2 %v1839_v24  ;;  %1062 = vmatpush.bf16.msrb.mxu3 %v1843_v29 }
 0x2ef   :  { %1024 = vmatpush.bf16.msrb.mxu0 %v1848_v37  ;;  %1037 = vmatpush.bf16.msra.mxu1 %v1876_v60 }
 0x2f0   :  { %1050 = vmatpush.bf16.msrb.mxu2 %v1851_v39  ;;  %1063 = vmatpush.bf16.msrb.mxu3 %v1855_v44 }
 0x2f3   :  { %1025 = vmatpush.bf16.msrb.mxu0 %v1858_v50  ;;  %1038 = vmatpush.bf16.msra.mxu1 %v1881_v2 }
 0x2f4   :  { %1051 = vmatpush.bf16.msrb.mxu2 %v1861_v52  ;;  %1064 = vmatpush.bf16.msrb.mxu3 %v1867_v54 }
 0x352   :  { %v849_v57 = vpop.f32.mrf.mxu0  ;;  %v862_v3 = vpop.f32.mrf.mxu1 }
 0x353   :  { %v892_v11 = vadd.f32 %v849_v57, %v835_v41  ;;  %v893_v22 = vadd.f32 %v862_v3, %v836_v13 }
 0x355   :  { %v896_v10 = vmul.f32 0.5, %v892_v11  ;;  %v900_v47 = vmul.f32 0.5, %v893_v22 }
 0x357   :  { %1586 = vtanh.f32 %v896_v10 }
 0x358   :  { %1588 = vtanh.f32 %v900_v47 }
 0x359   :  { %v875_v21 = vpop.f32.mrf.mxu2  ;;  %v888_v14 = vpop.f32.mrf.mxu3 }
 0x35a   :  { %v894_v20 = vadd.f32 %v875_v21, %v837_v12  ;;  %v895_v43 = vadd.f32 %v888_v14, %v838_v8  ;;  %v851_v38 = vpop.f32.mrf.mxu0  ;;  %v864_v25 = vpop.f32.mrf.mxu1  ;;  %v1013_v8 = vunpack.c.l.bf16 %v2023_v32  ;;  %v1014_v21 = vunpack.c.h.bf16 %v2023_v32 }
 0x35c   :  { %1590 = vtanh.f32 %v894_v20  ;;  %v905_v55 = vmul.f32 0.5, %v895_v43 }
 0x35d   :  { %v1587_v61 = vpop.eup %1586 }
 0x35e   :  { %v1589_v4 = vpop.eup %1588  ;;  %v898_v6 = vmul.f32 0.5, %v1587_v61  ;;  %1592 = vtanh.f32 %v905_v55  ;;  %v1015_v61 = vunpack.c.l.bf16 %v2013_v5 }
 0x35f   :  { %v902_v36 = vmul.f32 0.5, %v1589_v4  ;;  %v1016_v4 = vunpack.c.h.bf16 %v2013_v5 }
 0x360   :  { %v899_v26 = vadd.f32 0.5, %v898_v6 }
 0x361   :  { %v903_v9 = vadd.f32 0.5, %v902_v36  ;;  %v877_v53 = vpop.f32.mrf.mxu2  ;;  %v890_v62 = vpop.f32.mrf.mxu3 }
 0x362   :  { %v1591_v41 = vpop.eup %1590 }
 0x363   :  { %v909_v13 = vmul.f32 %v903_v9, %v2152_v42  ;;  %v910_v57 = vmul.f32 %v1591_v41, %v899_v26 }
 0x364   :  { %v1593_v3 = vpop.eup %1592 }
 0x365   :  { %v2192_v11 = vadd.f32 %v910_v57, %v909_v13  ;;  %v907_v22 = vmul.f32 0.5, %v1593_v3 }
 0x367   :  { %1594 = vtanh.f32 %v2192_v11  ;;  %v908_v10 = vadd.f32 0.5, %v907_v22 }
 0x36d   :  { %v1595_v47 = vpop.eup %1594 }
 0x36e   :  { %v913_v63 = vmul.f32 %v1595_v47, %v908_v10 }
 0x370   :  { %v928_v12 = vpack.c.bf16 %v913_v63, %v913_v63 }
 0x372   :  { %937 = vmatmul.bf16.vlgmr.msra.gmra.mxu0 %v928_v12  ;;  %950 = vmatmul.bf16.vlgmr.msrb.gmra.mxu1 %v928_v12 }
 0x373   :  { %963 = vmatmul.bf16.vlgmr.msra.gmra.mxu2 %v928_v12  ;;  %976 = vmatmul.bf16.vlgmr.msra.gmra.mxu3 %v928_v12 }
 0x374   :  { %1107 = vmatpush.bf16.msra.mxu0 %v1766_v23  ;;  %1120 = vmatpush.bf16.msrb.mxu1 %v1758_v18  ;;  %v924_v18 = vunpack.c.l.bf16 %v2015_v49 }
 0x375   :  { %1133 = vmatpush.bf16.msra.mxu2 %v1760_v19  ;;  %1146 = vmatpush.bf16.msra.mxu3 %v1770_v27  ;;  %v925_v19 = vunpack.c.h.bf16 %v2015_v49 }
 0x378   :  { %1108 = vmatpush.bf16.msra.mxu0 %v1779_v33  ;;  %1121 = vmatpush.bf16.msrb.mxu1 %v1775_v31 }
 0x379   :  { %1134 = vmatpush.bf16.msra.mxu2 %v1781_v34  ;;  %1147 = vmatpush.bf16.msra.mxu3 %v1784_v40 }
 0x37c   :  { %1109 = vmatpush.bf16.msra.mxu0 %v1791_v46  ;;  %1122 = vmatpush.bf16.msrb.mxu1 %v1787_v45  ;;  %v926_v45 = vunpack.c.l.bf16 %v2006_v35  ;;  %v927_v46 = vunpack.c.h.bf16 %v2006_v35 }
 0x37d   :  { %1135 = vmatpush.bf16.msra.mxu2 %v1793_v48  ;;  %1148 = vmatpush.bf16.msra.mxu3 %v1796_v51 }
 0x380   :  { %1110 = vmatpush.bf16.msra.mxu0 %v1802_v58  ;;  %1123 = vmatpush.bf16.msrb.mxu1 %v1799_v56 }
 0x381   :  { %1136 = vmatpush.bf16.msra.mxu2 %v1805_v59  ;;  %1149 = vmatpush.bf16.msra.mxu3 %v1813_v0 }
 0x384   :  { %1111 = vmatpush.bf16.msra.mxu0 %v1817_v1  ;;  %1124 = vmatpush.bf16.msrb.mxu1 %v1836_v17 }
 0x385   :  { %1137 = vmatpush.bf16.msra.mxu2 %v1827_v7  ;;  %1150 = vmatpush.bf16.msra.mxu3 %v1831_v15 }
 0x388   :  { %1112 = vmatpush.bf16.msra.mxu0 %v1834_v16  ;;  %1125 = vmatpush.bf16.msrb.mxu1 %v1845_v30 }
 0x389   :  { %1138 = vmatpush.bf16.msra.mxu2 %v1839_v24  ;;  %1151 = vmatpush.bf16.msra.mxu3 %v1843_v29 }
 0x38c   :  { %1113 = vmatpush.bf16.msra.mxu0 %v1848_v37  ;;  %1126 = vmatpush.bf16.msrb.mxu1 %v1876_v60 }
 0x38d   :  { %1139 = vmatpush.bf16.msra.mxu2 %v1851_v39  ;;  %1152 = vmatpush.bf16.msra.mxu3 %v1855_v44 }
 0x390   :  { %1114 = vmatpush.bf16.msra.mxu0 %v1858_v50  ;;  %1127 = vmatpush.bf16.msrb.mxu1 %v1881_v2 }
 0x391   :  { %1140 = vmatpush.bf16.msra.mxu2 %v1861_v52  ;;  %1153 = vmatpush.bf16.msra.mxu3 %v1867_v54 }
 0x3ef   :  { %v938_v23 = vpop.f32.mrf.mxu0  ;;  %v951_v27 = vpop.f32.mrf.mxu1 }
 0x3f0   :  { %v981_v31 = vadd.f32 %v938_v23, %v924_v18  ;;  %v982_v33 = vadd.f32 %v951_v27, %v925_v19 }
 0x3f2   :  { %v985_v34 = vmul.f32 0.5, %v981_v31  ;;  %v989_v40 = vmul.f32 0.5, %v982_v33 }
 0x3f4   :  { %1596 = vtanh.f32 %v985_v34 }
 0x3f5   :  { %1598 = vtanh.f32 %v989_v40  ;;  %v1538_v40 = vld [vmem:[%s2274_s4 + $0x38] sm:$0xff] }
 0x3f6   :  { %v964_v48 = vpop.f32.mrf.mxu2  ;;  %v977_v51 = vpop.f32.mrf.mxu3 }
 0x3f7   :  { %v983_v56 = vadd.f32 %v964_v48, %v926_v45  ;;  %v984_v58 = vadd.f32 %v977_v51, %v927_v46  ;;  %v940_v59 = vpop.f32.mrf.mxu0  ;;  %v953_v0 = vpop.f32.mrf.mxu1  ;;  %v1537_v45 = vld [vmem:[%s2274_s4 + $0x30] sm:$0xff]  ;;  %v1536_v46 = vld [vmem:[%s2274_s4 + $0x28] sm:$0xff]  ;;  %v1535_v48 = vld [vmem:[%s2274_s4 + $0x20] sm:$0xff] }
 0x3f8   :  { %v1534_v51 = vld [vmem:[%s2274_s4 + $0x18] sm:$0xff]  ;;  %v1531_v59 = vld [vmem:[%s2274_s4] sm:$0xff]  ;;  %v1102_v0 = vunpack.c.l.bf16 %v2029_v28 }
 0x3f9   :  { %1600 = vtanh.f32 %v983_v56  ;;  %v994_v1 = vmul.f32 0.5, %v984_v58  ;;  %v1533_v56 = vld [vmem:[%s2274_s4 + $0x10] sm:$0xff]  ;;  %v1532_v58 = vld [vmem:[%s2274_s4 + $0x8] sm:$0xff] }
 0x3fa   :  { %v1597_v7 = vpop.eup %1596 }
 0x3fb   :  { %v1599_v15 = vpop.eup %1598  ;;  %v987_v16 = vmul.f32 0.5, %v1597_v7  ;;  %1602 = vtanh.f32 %v994_v1  ;;  %v1103_v1 = vunpack.c.h.bf16 %v2029_v28 }
 0x3fc   :  { %v991_v17 = vmul.f32 0.5, %v1599_v15 }
 0x3fd   :  { %v988_v24 = vadd.f32 0.5, %v987_v16 }
 0x3fe   :  { %v992_v29 = vadd.f32 0.5, %v991_v17  ;;  %v966_v30 = vpop.f32.mrf.mxu2  ;;  %v979_v37 = vpop.f32.mrf.mxu3 }
 0x3ff   :  { %v1601_v39 = vpop.eup %1600  ;;  %v2291_v30 = vld [vmem:[#allocation15_spill] sm:$0xff] }
 0x400   :  { %v998_v44 = vmul.f32 %v992_v29, %v2192_v11  ;;  %v999_v50 = vmul.f32 %v1601_v39, %v988_v24  ;;  %v1104_v37 = vunpack.c.l.bf16 %v2291_v30  ;;  %v1105_v39 = vunpack.c.h.bf16 %v2291_v30 }
 0x401   :  { %v1603_v52 = vpop.eup %1602 }
 0x402   :  { %v1000_v54 = vadd.f32 %v999_v50, %v998_v44  ;;  %v996_v60 = vmul.f32 0.5, %v1603_v52 }
 0x404   :  { %1604 = vtanh.f32 %v1000_v54  ;;  %v997_v2 = vadd.f32 0.5, %v996_v60 }
 0x40a   :  { %v1605_v35 = vpop.eup %1604 }
 0x40b   :  { %v1002_v49 = vmul.f32 %v1605_v35, %v997_v2 }
 0x40d   :  { %v1017_v42 = vpack.c.bf16 %v1002_v49, %v1002_v49 }
 0x40f   :  { %1026 = vmatmul.bf16.vlgmr.msrb.gmra.mxu0 %v1017_v42  ;;  %1039 = vmatmul.bf16.vlgmr.msra.gmra.mxu1 %v1017_v42 }
 0x410   :  { %1052 = vmatmul.bf16.vlgmr.msrb.gmra.mxu2 %v1017_v42  ;;  %1065 = vmatmul.bf16.vlgmr.msrb.gmra.mxu3 %v1017_v42 }
 0x411   :  { %1262 = vmatpush.bf16.msrb.mxu0 %v1538_v40 }
 0x415   :  { %1263 = vmatpush.bf16.msrb.mxu0 %v1537_v45 }
 0x419   :  { %1264 = vmatpush.bf16.msrb.mxu0 %v1536_v46 }
 0x41d   :  { %1265 = vmatpush.bf16.msrb.mxu0 %v1535_v48 }
 0x421   :  { %1266 = vmatpush.bf16.msrb.mxu0 %v1534_v51 }
 0x425   :  { %1267 = vmatpush.bf16.msrb.mxu0 %v1533_v56 }
 0x429   :  { %1268 = vmatpush.bf16.msrb.mxu0 %v1532_v58 }
 0x42d   :  { %1269 = vmatpush.bf16.msrb.mxu0 %v1531_v59 }
 0x48c   :  { %v1027_v14 = vpop.f32.mrf.mxu0  ;;  %v1040_v20 = vpop.f32.mrf.mxu1 }
 0x48d   :  { %v1070_v43 = vadd.f32 %v1027_v14, %v1013_v8  ;;  %v1071_v38 = vadd.f32 %v1040_v20, %v1014_v21 }
 0x48f   :  { %v1074_v25 = vmul.f32 0.5, %v1070_v43  ;;  %v1078_v55 = vmul.f32 0.5, %v1071_v38 }
 0x491   :  { %1606 = vtanh.f32 %v1074_v25 }
 0x492   :  { %1608 = vtanh.f32 %v1078_v55 }
 0x493   :  { %v1053_v6 = vpop.f32.mrf.mxu2  ;;  %v1066_v36 = vpop.f32.mrf.mxu3 }
 0x494   :  { %v1072_v26 = vadd.f32 %v1053_v6, %v1015_v61  ;;  %v1073_v9 = vadd.f32 %v1066_v36, %v1016_v4  ;;  %v1029_v53 = vpop.f32.mrf.mxu0  ;;  %v1042_v62 = vpop.f32.mrf.mxu1 }
 0x495   :  { %v1545_v62 = vld [vmem:[%s2275_s5] ss:$0 sm:$0xff] }
 0x496   :  { %1610 = vtanh.f32 %v1072_v26  ;;  %v1083_v32 = vmul.f32 0.5, %v1073_v9 }
 0x497   :  { %v1607_v41 = vpop.eup %1606 }
 0x498   :  { %v1609_v13 = vpop.eup %1608  ;;  %v1076_v57 = vmul.f32 0.5, %v1607_v41  ;;  %1612 = vtanh.f32 %v1083_v32 }
 0x499   :  { %v1080_v3 = vmul.f32 0.5, %v1609_v13 }
 0x49a   :  { %v1077_v11 = vadd.f32 0.5, %v1076_v57 }
 0x49b   :  { %v1081_v22 = vadd.f32 0.5, %v1080_v3  ;;  %v1055_v10 = vpop.f32.mrf.mxu2  ;;  %v1068_v47 = vpop.f32.mrf.mxu3 }
 0x49c   :  { %v1611_v63 = vpop.eup %1610 }
 0x49d   :  { %v1087_v12 = vmul.f32 %v1081_v22, %v1000_v54  ;;  %v1088_v5 = vmul.f32 %v1611_v63, %v1077_v11 }
 0x49e   :  { %v1613_v18 = vpop.eup %1612 }
 0x49f   :  { %v1089_v19 = vadd.f32 %v1088_v5, %v1087_v12  ;;  %v1085_v23 = vmul.f32 0.5, %v1613_v18 }
 0x4a1   :  { %1614 = vtanh.f32 %v1089_v19  ;;  %v1086_v27 = vadd.f32 0.5, %v1085_v23 }
 0x4a7   :  { %v1615_v31 = vpop.eup %1614 }
 0x4a8   :  { %v1091_v33 = vmul.f32 %v1615_v31, %v1086_v27 }
 0x4aa   :  { %v1106_v34 = vpack.c.bf16 %v1091_v33, %v1091_v33 }
 0x4ac   :  { %1115 = vmatmul.bf16.vlgmr.msra.gmra.mxu0 %v1106_v34  ;;  %1128 = vmatmul.bf16.vlgmr.msrb.gmra.mxu1 %v1106_v34 }
 0x4ad   :  { %1141 = vmatmul.bf16.vlgmr.msra.gmra.mxu2 %v1106_v34  ;;  %1154 = vmatmul.bf16.vlgmr.msra.gmra.mxu3 %v1106_v34 }
 0x529   :  { %v1116_v7 = vpop.f32.mrf.mxu0  ;;  %v1129_v15 = vpop.f32.mrf.mxu1 }
 0x52a   :  { %v1159_v16 = vadd.f32 %v1116_v7, %v1102_v0  ;;  %v1160_v17 = vadd.f32 %v1129_v15, %v1103_v1 }
 0x52c   :  { %v1163_v24 = vmul.f32 0.5, %v1159_v16  ;;  %v1167_v29 = vmul.f32 0.5, %v1160_v17 }
 0x52e   :  { %1616 = vtanh.f32 %v1163_v24 }
 0x52f   :  { %1618 = vtanh.f32 %v1167_v29 }
 0x530   :  { %v1142_v44 = vpop.f32.mrf.mxu2  ;;  %v1155_v50 = vpop.f32.mrf.mxu3 }
 0x531   :  { %v1161_v52 = vadd.f32 %v1142_v44, %v1104_v37  ;;  %v1162_v54 = vadd.f32 %v1155_v50, %v1105_v39  ;;  %v1118_v60 = vpop.f32.mrf.mxu0  ;;  %v1131_v2 = vpop.f32.mrf.mxu1 }
 0x533   :  { %1620 = vtanh.f32 %v1161_v52  ;;  %v1172_v28 = vmul.f32 0.5, %v1162_v54 }
 0x534   :  { %v1617_v35 = vpop.eup %1616 }
 0x535   :  { %v1619_v49 = vpop.eup %1618  ;;  %v1165_v42 = vmul.f32 0.5, %v1617_v35  ;;  %1622 = vtanh.f32 %v1172_v28 }
 0x536   :  { %v1169_v8 = vmul.f32 0.5, %v1619_v49 }
 0x537   :  { %v1166_v21 = vadd.f32 0.5, %v1165_v42 }
 0x538   :  { %v1170_v14 = vadd.f32 0.5, %v1169_v8  ;;  %v1144_v20 = vpop.f32.mrf.mxu2  ;;  %v1157_v43 = vpop.f32.mrf.mxu3 }
 0x539   :  { %v1621_v38 = vpop.eup %1620 }
 0x53a   :  { %v1176_v25 = vmul.f32 %v1170_v14, %v1089_v19  ;;  %v1177_v55 = vmul.f32 %v1621_v38, %v1166_v21 }
 0x53b   :  { %v1623_v61 = vpop.eup %1622 }
 0x53c   :  { %v1178_v4 = vadd.f32 %v1177_v55, %v1176_v25  ;;  %v1174_v6 = vmul.f32 0.5, %v1623_v61 }
 0x53e   :  { %1624 = vtanh.f32 %v1178_v4  ;;  %v1175_v36 = vadd.f32 0.5, %v1174_v6 }
 0x544   :  { %v1625_v26 = vpop.eup %1624 }
 0x545   :  { %v1180_v9 = vmul.f32 %v1625_v26, %v1175_v36 }
 0x547   :  { %v1193_v53 = vpack.c.bf16 %v1180_v9, %v1180_v9 }
 0x549   :  { %1270 = vmatmul.bf16.vlgmr.msrb.gmra.mxu0 %v1193_v53 }
 0x5c6   :  { %v1271_v32 = vpop.f32.mrf.mxu0 }
 0x5c7   :  { %v1272_v41 = vadd.f32 %v1545_v62, %v1271_v32 }
 0x5c9   :  { %1276 = vst.msk [vmem:[%s2276_s6] sm:$0xff] %vm1275_vm1, %v1272_v41 }
 0x5ce   :  { %v1273_v13 = vpop.f32.mrf.mxu0 }
 0x5cf   :  { %1281 = vsyncpa [#allocation6], 1 }
 0x5d0   :  { %1282 = vsyncpa [#allocation8], 1 }

</bundles_post_ra>
